<compile_context>
chip_gen: v7x
topology: tpu7x:2x2x1
jax: 0.10.0
libtpu: 0.0.40
codegen_flags: <defaults>
</compile_context>

<pallas_src>
import jax
import jax.numpy as jnp
from jax.experimental import pallas as pl
from jax.experimental.pallas import tpu as pltpu

OUT_PAD = 128   # lane-dense padded output width (real logits = 10)
TB = 128        # batch tile (MXU-aligned on v5e/v6e/v7x)


def mlp_kernel(x_ref, w1_ref, b1_ref, w2_ref, b2_ref, w3_ref, b3_ref, o_ref):
    # x tile: (TB, 784) bf16; weights bf16 (VMEM-resident across grid steps);
    # biases f32 rows (1, N); all matmuls accumulate in f32 on the MXU.
    x = x_ref[...]

    h1 = jnp.dot(x, w1_ref[...], preferred_element_type=jnp.float32)
    h1 = jnp.maximum(h1 + b1_ref[...], 0.0)                      # (TB, 512) f32

    h2 = jnp.dot(h1.astype(jnp.bfloat16), w2_ref[...],
                 preferred_element_type=jnp.float32)
    h2 = jnp.maximum(h2 + b2_ref[...], 0.0)                      # (TB, 512) f32

    logits = jnp.dot(h2.astype(jnp.bfloat16), w3_ref[...],
                     preferred_element_type=jnp.float32)
    logits = logits + b3_ref[...]                                # (TB, 128) f32

    o_ref[...] = logits.astype(o_ref.dtype)


def neural_network_v1(x, params):
    """x: (B, C, H, W) with C*H*W == 784. Returns (B, 10) f32 logits."""
    w1, b1, w2, b2, w3, b3 = params
    B = x.shape[0]

    # nn.Flatten() + cast to bf16 (f32 accumulation happens inside the kernel).
    x2d = x.reshape(B, -1).astype(jnp.bfloat16)                  # (B, 784)

    # Pad batch up to a multiple of the MXU-aligned tile TB.
    B_pad = pl.cdiv(B, TB) * TB
    if B_pad != B:
        x2d = jnp.pad(x2d, ((0, B_pad - B), (0, 0)))

    # bf16 weights; f32 bias rows (added after the f32 accumulation).
    w1b = w1.astype(jnp.bfloat16)
    w2b = w2.astype(jnp.bfloat16)
    # Lane-dense output: pad the last layer to OUT_PAD columns with zeros.
    w3p = jnp.zeros((w3.shape[0], OUT_PAD), jnp.bfloat16).at[:, :10].set(
        w3.astype(jnp.bfloat16))
    b1r = b1.reshape(1, -1).astype(jnp.float32)
    b2r = b2.reshape(1, -1).astype(jnp.float32)
    b3r = jnp.zeros((1, OUT_PAD), jnp.float32).at[:, :10].set(
        b3.astype(jnp.float32))

    num_tiles = B_pad // TB

    # Weights/biases: full-shape blocks with a constant index_map -> fetched
    # once, resident in VMEM across all grid iterations.
    resident = lambda a: pl.BlockSpec(a.shape, lambda i: (0,) * a.ndim)

    out_padded = pl.pallas_call(
        mlp_kernel,
        out_shape=jax.ShapeDtypeStruct((B_pad, OUT_PAD), jnp.float32),
        grid_spec=pl.GridSpec(
            grid=(num_tiles,),
            in_specs=[
                pl.BlockSpec((TB, 784), lambda i: (i, 0)),       # x tile
                resident(w1b), resident(b1r),
                resident(w2b), resident(b2r),
                resident(w3p), resident(b3r),
            ],
            out_specs=pl.BlockSpec((TB, OUT_PAD), lambda i: (i, 0)),
        ),
        compiler_params=pltpu.CompilerParams(
            dimension_semantics=("parallel",),
            vmem_limit_bytes=32 << 20,
        ),
    )(x2d, w1b, b1r, w2b, b2r, w3p, b3r)

    # Strip batch padding and the lane padding of the last layer.
    return out_padded[:B, :10]


def init_params(key):
    """Deterministic synthetic parameters with the module's shapes.

    Weights are stored transposed relative to PyTorch (in_features,
    out_features) so the kernel computes x @ W directly.
    """
    k1, k2, k3, k4, k5, k6 = jax.random.split(key, 6)
    scale = lambda fan_in: 1.0 / jnp.sqrt(jnp.float32(fan_in))
    w1 = jax.random.uniform(k1, (784, 512), jnp.float32, -1.0, 1.0) * scale(784)
    b1 = jax.random.uniform(k2, (512,), jnp.float32, -1.0, 1.0) * scale(784)
    w2 = jax.random.uniform(k3, (512, 512), jnp.float32, -1.0, 1.0) * scale(512)
    b2 = jax.random.uniform(k4, (512,), jnp.float32, -1.0, 1.0) * scale(512)
    w3 = jax.random.uniform(k5, (512, 10), jnp.float32, -1.0, 1.0) * scale(512)
    b3 = jax.random.uniform(k6, (10,), jnp.float32, -1.0, 1.0) * scale(512)
    return (w1, b1, w2, b2, w3, b3)


def reference(x, params):
    """Reference that mirrors the kernel's precision policy:
    bf16 inputs to every matmul, f32 accumulation, f32 bias add."""
    w1, b1, w2, b2, w3, b3 = params
    h = x.reshape(x.shape[0], -1).astype(jnp.bfloat16)
    h = jnp.dot(h, w1.astype(jnp.bfloat16), preferred_element_type=jnp.float32)
    h = jnp.maximum(h + b1, 0.0)
    h = jnp.dot(h.astype(jnp.bfloat16), w2.astype(jnp.bfloat16),
                preferred_element_type=jnp.float32)
    h = jnp.maximum(h + b2, 0.0)
    h = jnp.dot(h.astype(jnp.bfloat16), w3.astype(jnp.bfloat16),
                preferred_element_type=jnp.float32)
    return h + b3


if __name__ == "__main__":
    key = jax.random.PRNGKey(0)
    kx, kp = jax.random.split(key)

    # Small batch of MNIST-shaped inputs: (B, 1, 28, 28) NCHW.
    x = jax.random.normal(kx, (2, 1, 28, 28), jnp.float32)
    params = init_params(kp)

    out = neural_network_v1(x, params)
    out = jax.block_until_ready(out)

    ref = reference(x, params)
    assert out.shape == (2, 10), out.shape
    assert jnp.allclose(out, ref, atol=1e-2, rtol=1e-2), (
        float(jnp.max(jnp.abs(out - ref))))

    print("KERNEL_OK")
</pallas_src>

<mosaic_0001>
module attributes {stable_mosaic.version = 11 : i64} {
  func.func @mlp_kernel(%arg0: i32, %arg1: memref<128x784xbf16, #tpu.memory_space<vmem>>, %arg2: memref<784x512xbf16, #tpu.memory_space<vmem>>, %arg3: memref<1x512xf32, #tpu.memory_space<vmem>>, %arg4: memref<512x512xbf16, #tpu.memory_space<vmem>>, %arg5: memref<1x512xf32, #tpu.memory_space<vmem>>, %arg6: memref<512x128xbf16, #tpu.memory_space<vmem>>, %arg7: memref<1x128xf32, #tpu.memory_space<vmem>>, %arg8: memref<128x128xf32, #tpu.memory_space<vmem>>) attributes {dimension_semantics = [#tpu.dimension_semantics<parallel>], iteration_bounds = array<i64: 1>, scalar_prefetch = 0 : i64, scratch_operands = 0 : i64, tpu.core_type = #tpu.core_type<tc>, window_params = [{transform_indices = @transform_0, window_bounds = array<i64: 128, 784>}, {pipeline_mode = #tpu.pipeline_mode<synchronous>, transform_indices = @transform_1, window_bounds = array<i64: 784, 512>}, {pipeline_mode = #tpu.pipeline_mode<synchronous>, transform_indices = @transform_2, window_bounds = array<i64: 1, 512>}, {pipeline_mode = #tpu.pipeline_mode<synchronous>, transform_indices = @transform_3, window_bounds = array<i64: 512, 512>}, {pipeline_mode = #tpu.pipeline_mode<synchronous>, transform_indices = @transform_4, window_bounds = array<i64: 1, 512>}, {pipeline_mode = #tpu.pipeline_mode<synchronous>, transform_indices = @transform_5, window_bounds = array<i64: 512, 128>}, {pipeline_mode = #tpu.pipeline_mode<synchronous>, transform_indices = @transform_6, window_bounds = array<i64: 1, 128>}, {transform_indices = @transform_7, window_bounds = array<i64: 128, 128>}]} {
    %c0 = arith.constant 0 : index
    %c0_0 = arith.constant 0 : index
    %0 = vector.load %arg1[%c0, %c0_0] : memref<128x784xbf16, #tpu.memory_space<vmem>>, vector<128x784xbf16>
    %c0_1 = arith.constant 0 : index
    %c0_2 = arith.constant 0 : index
    %1 = vector.load %arg2[%c0_1, %c0_2] : memref<784x512xbf16, #tpu.memory_space<vmem>>, vector<784x512xbf16>
    %cst = arith.constant dense<0.000000e+00> : vector<128x512xf32>
    %2 = tpu.matmul %0, %1, %cst {dimension_numbers = #tpu.dot_dimension_numbers<[1], [0], [0], [1], [0, 0, 1, 1], [], []>} : vector<128x784xbf16>, vector<784x512xbf16>, vector<128x512xf32> -> vector<128x512xf32>
    %c0_3 = arith.constant 0 : index
    %c0_4 = arith.constant 0 : index
    %3 = vector.load %arg3[%c0_3, %c0_4] : memref<1x512xf32, #tpu.memory_space<vmem>>, vector<1x512xf32>
    %4 = vector.broadcast %3 : vector<1x512xf32> to vector<128x512xf32>
    %5 = arith.addf %2, %4 : vector<128x512xf32>
    %cst_5 = arith.constant 0.000000e+00 : f32
    %6 = vector.broadcast %cst_5 : f32 to vector<128x512xf32>
    %7 = arith.maximumf %5, %6 : vector<128x512xf32>
    %8 = arith.truncf %7 : vector<128x512xf32> to vector<128x512xbf16>
    %c0_6 = arith.constant 0 : index
    %c0_7 = arith.constant 0 : index
    %9 = vector.load %arg4[%c0_6, %c0_7] : memref<512x512xbf16, #tpu.memory_space<vmem>>, vector<512x512xbf16>
    %cst_8 = arith.constant dense<0.000000e+00> : vector<128x512xf32>
    %10 = tpu.matmul %8, %9, %cst_8 {dimension_numbers = #tpu.dot_dimension_numbers<[1], [0], [0], [1], [0, 0, 1, 1], [], []>} : vector<128x512xbf16>, vector<512x512xbf16>, vector<128x512xf32> -> vector<128x512xf32>
    %c0_9 = arith.constant 0 : index
    %c0_10 = arith.constant 0 : index
    %11 = vector.load %arg5[%c0_9, %c0_10] : memref<1x512xf32, #tpu.memory_space<vmem>>, vector<1x512xf32>
    %12 = vector.broadcast %11 : vector<1x512xf32> to vector<128x512xf32>
    %13 = arith.addf %10, %12 : vector<128x512xf32>
    %cst_11 = arith.constant 0.000000e+00 : f32
    %14 = vector.broadcast %cst_11 : f32 to vector<128x512xf32>
    %15 = arith.maximumf %13, %14 : vector<128x512xf32>
    %16 = arith.truncf %15 : vector<128x512xf32> to vector<128x512xbf16>
    %c0_12 = arith.constant 0 : index
    %c0_13 = arith.constant 0 : index
    %17 = vector.load %arg6[%c0_12, %c0_13] : memref<512x128xbf16, #tpu.memory_space<vmem>>, vector<512x128xbf16>
    %cst_14 = arith.constant dense<0.000000e+00> : vector<128x128xf32>
    %18 = tpu.matmul %16, %17, %cst_14 {dimension_numbers = #tpu.dot_dimension_numbers<[1], [0], [0], [1], [0, 0, 1, 1], [], []>} : vector<128x512xbf16>, vector<512x128xbf16>, vector<128x128xf32> -> vector<128x128xf32>
    %c0_15 = arith.constant 0 : index
    %c0_16 = arith.constant 0 : index
    %19 = vector.load %arg7[%c0_15, %c0_16] : memref<1x128xf32, #tpu.memory_space<vmem>>, vector<1x128xf32>
    %20 = vector.broadcast %19 : vector<1x128xf32> to vector<128x128xf32>
    %21 = arith.addf %18, %20 : vector<128x128xf32>
    %c0_17 = arith.constant 0 : index
    %c0_18 = arith.constant 0 : index
    %22 = vector.load %arg8[%c0_17, %c0_18] : memref<128x128xf32, #tpu.memory_space<vmem>>, vector<128x128xf32>
    tpu.vector_store %arg8[%c0_17, %c0_18], %21 {strides = array<i32>} : memref<128x128xf32, #tpu.memory_space<vmem>>, vector<128x128xf32>,
    return
  }
  func.func @transform_0(%arg0: i32) -> (i32, i32) {
    %c0_i32 = arith.constant 0 : i32
    %c0_i32_0 = arith.constant 0 : i32
    return %arg0, %c0_i32 : i32, i32
  }
  func.func @transform_1(%arg0: i32) -> (i32, i32) {
    %c0_i32 = arith.constant 0 : i32
    %c0_i32_0 = arith.constant 0 : i32
    %c0_i32_1 = arith.constant 0 : i32
    return %c0_i32, %c0_i32_0 : i32, i32
  }
  func.func @transform_2(%arg0: i32) -> (i32, i32) {
    %c0_i32 = arith.constant 0 : i32
    %c0_i32_0 = arith.constant 0 : i32
    %c0_i32_1 = arith.constant 0 : i32
    return %c0_i32, %c0_i32_0 : i32, i32
  }
  func.func @transform_3(%arg0: i32) -> (i32, i32) {
    %c0_i32 = arith.constant 0 : i32
    %c0_i32_0 = arith.constant 0 : i32
    %c0_i32_1 = arith.constant 0 : i32
    return %c0_i32, %c0_i32_0 : i32, i32
  }
  func.func @transform_4(%arg0: i32) -> (i32, i32) {
    %c0_i32 = arith.constant 0 : i32
    %c0_i32_0 = arith.constant 0 : i32
    %c0_i32_1 = arith.constant 0 : i32
    return %c0_i32, %c0_i32_0 : i32, i32
  }
  func.func @transform_5(%arg0: i32) -> (i32, i32) {
    %c0_i32 = arith.constant 0 : i32
    %c0_i32_0 = arith.constant 0 : i32
    %c0_i32_1 = arith.constant 0 : i32
    return %c0_i32, %c0_i32_0 : i32, i32
  }
  func.func @transform_6(%arg0: i32) -> (i32, i32) {
    %c0_i32 = arith.constant 0 : i32
    %c0_i32_0 = arith.constant 0 : i32
    %c0_i32_1 = arith.constant 0 : i32
    return %c0_i32, %c0_i32_0 : i32, i32
  }
  func.func @transform_7(%arg0: i32) -> (i32, i32) {
    %c0_i32 = arith.constant 0 : i32
    %c0_i32_0 = arith.constant 0 : i32
    return %arg0, %c0_i32 : i32, i32
  }
}

</mosaic_0001>

<bundles_post_ra>
// kernel: tpu_custom_call.1
= control target key start
LH: loop header
LB: loop body
LE: loop exit
PB: predicated region body
PF: predicated region fallthrough
CT: control target
= control target key end

     0   :  { %12 = vsyncpa [#allocation3], 0  ;;  %s6708_s0 = inlined_call_operand.vmem [shape: bf16[128,784], index: 0, kind: input, shape index: {}]   ;;  %s6709_s1 = inlined_call_operand.hbm [shape: bf16[784,512], index: 1, kind: input, shape index: {}]   ;;  %s6710_s2 = inlined_call_operand.vmem [shape: f32[1,512], index: 2, kind: input, shape index: {}]   ;;  %s6711_s3 = inlined_call_operand.hbm [shape: bf16[512,512], index: 3, kind: input, shape index: {}]   ;;  %s6712_s4 = inlined_call_operand.vmem [shape: f32[1,512], index: 4, kind: input, shape index: {}]   ;;  %s6713_s5 = inlined_call_operand.vmem [shape: bf16[512,128], index: 5, kind: input, shape index: {}]   ;;  %s6714_s6 = inlined_call_operand.vmem [shape: f32[1,128], index: 6, kind: input, shape index: {}]   ;;  %s6715_s7 = inlined_call_operand.hbm [shape: f32[128,128], index: 7, kind: output, shape index: {}]  }
   0x1   :  { %13 = vsyncpa [#allocation6], 0 }
   0x2   :  { %14 = vsyncpa [#allocation4], 0  ;;  %s6071_s24 = smov [#allocation2]   ;;  %s5999_s28 = scalar_lea.hbm %s6709_s1, 25088 }
   0x3   :  { %s22_s25 = sshll.u32 %s6071_s24, 4  ;;  %p6000_p0 = scmp.ne.s32.totalorder %s6709_s1, %s5999_s28  ;;  %s23_s25 = int_to_ptr.vmem [resolvable:$true] %s22_s25 }
   0x4   :  { %p6003_p1 = scmp.lt.u32.totalorder %s5999_s28, %s6709_s1 }
   0x6   :  { %p6005_p2 = pnand %p6003_p1, %p6000_p0 }
   0x8   :  { %6008 = shalt.err (!%p6005_p2)
}
   0x9   :  { %s6009_s10 = scalar_lea.vmem %s23_s25, 25088  ;;  %p6014_p4 = scmp.lt.s32.totalorder %s23_s25, %s23_s25 }
   0xa   :  { %p6010_p3 = scmp.ne.s32.totalorder %s23_s25, %s6009_s10  ;;  %p6015_p5 = scmp.lt.s32.totalorder %s6009_s10, %s6009_s10 }
   0xc   :  { %p6016_p6 = por %p6015_p5, %p6014_p4 }
   0xe   :  { %p6017_p7 = pnand %p6016_p6, %p6010_p3 }
  0x10   :  { %6020 = shalt.err (!%p6017_p7)
}
  0x11   :  { %s6072_s11 = smov 256   ;;  %s6073_s12 = smov 16  }
  0x12   :  { %28 = dma.hbm_to_vmem [thread:$0]  %s6709_s1, 25088, %s23_s25, [#allocation3], %s6072_s11, %s6072_s11, %s6073_s12  }
  0x13   :  { %s6074_s15 = smov [#allocation5]   ;;  %s6021_s19 = scalar_lea.hbm %s6711_s3, 16384 }
  0x14   :  { %s36_s16 = sshll.u32 %s6074_s15, 4  ;;  %p6022_p8 = scmp.ne.s32.totalorder %s6711_s3, %s6021_s19  ;;  %s37_s16 = int_to_ptr.vmem [resolvable:$true] %s36_s16 }
  0x15   :  { %p6025_p9 = scmp.lt.u32.totalorder %s6021_s19, %s6711_s3 }
  0x17   :  { %p6027_p10 = pnand %p6025_p9, %p6022_p8 }
  0x19   :  { %6030 = shalt.err (!%p6027_p10)
}
  0x1a   :  { %s6031_s24 = scalar_lea.vmem %s37_s16, 16384  ;;  %p6036_p12 = scmp.lt.s32.totalorder %s37_s16, %s37_s16 }
  0x1b   :  { %p6032_p11 = scmp.ne.s32.totalorder %s37_s16, %s6031_s24  ;;  %p6037_p13 = scmp.lt.s32.totalorder %s6031_s24, %s6031_s24 }
  0x1d   :  { %p6038_p0 = por %p6037_p13, %p6036_p12 }
  0x1f   :  { %p6039_p1 = pnand %p6038_p0, %p6032_p11 }
  0x21   :  { %6042 = shalt.err (!%p6039_p1)
}
  0x22   :  { %42 = dma.hbm_to_vmem [thread:$0]  %s6711_s3, 16384, %s37_s16, [#allocation6], %s6072_s11, %s6072_s11, %s6073_s12  }
  0x23   :  { %6065 = dma.done.wait [#allocation3], 25088  }
  0x24   :  { %6066 = vsyncadd [#allocation3], 4294942208 }
  0x25   :  { %6067 = dma.done.wait [#allocation6], 16384  }
  0x26   :  { %6068 = vsyncadd [#allocation6], 4294950912  ;;  %v5401_v0 = vld [vmem:[#allocation2 + $0x4] ss:$16 sps:$4 sm:$0xff]   ;;  %v5403_v1 = vld [vmem:[#allocation2 + $0xc] ss:$16 sps:$4 sm:$0xff]  }
  0x27   :  { %1623 = vmatprep.subr.bf16.mxu0 %v5401_v0  ;;  %v5405_v2 = vld [vmem:[#allocation2] ss:$16 sps:$4 sm:$0xff]   ;;  %v5406_v3 = vld [vmem:[#allocation2 + $0x8] ss:$16 sps:$4 sm:$0xff]   ;;  %2075 = vmatprep.subr.bf16.mxu1 %v5403_v1  ;;  %v5407_v4 = vld [vmem:[#allocation2 + $0x24] ss:$16 sps:$4 sm:$0xff]  }
  0x28   :  { %1624 = vmatpush1.bf16.msra.mxu0 %v5405_v2  ;;  %2076 = vmatpush1.bf16.msra.mxu1 %v5406_v3  ;;  %v5409_v5 = vld [vmem:[#allocation2 + $0x2c] ss:$16 sps:$4 sm:$0xff]   ;;  %v5411_v6 = vld [vmem:[#allocation2 + $0x20] ss:$16 sps:$4 sm:$0xff]   ;;  %v5412_v7 = vld [vmem:[#allocation2 + $0x28] ss:$16 sps:$4 sm:$0xff]  }
  0x29   :  { %1625 = vmatprep.subr.bf16.mxu0 %v5407_v4  ;;  %2077 = vmatprep.subr.bf16.mxu1 %v5409_v5  ;;  %v5413_v8 = vld [vmem:[#allocation2 + $0x44] ss:$16 sps:$4 sm:$0xff]   ;;  %v5415_v9 = vld [vmem:[#allocation2 + $0x4c] ss:$16 sps:$4 sm:$0xff]   ;;  %v5417_v10 = vld [vmem:[#allocation2 + $0x40] ss:$16 sps:$4 sm:$0xff]  }
  0x2a   :  { %v5418_v11 = vld [vmem:[#allocation2 + $0x48] ss:$16 sps:$4 sm:$0xff]   ;;  %v5419_v12 = vld [vmem:[#allocation2 + $0x64] ss:$16 sps:$4 sm:$0xff]   ;;  %v5421_v13 = vld [vmem:[#allocation2 + $0x6c] ss:$16 sps:$4 sm:$0xff]  }
  0x2b   :  { %v5423_v14 = vld [vmem:[#allocation2 + $0x60] ss:$16 sps:$4 sm:$0xff]   ;;  %v5424_v15 = vld [vmem:[#allocation2 + $0x68] ss:$16 sps:$4 sm:$0xff]   ;;  %v5425_v16 = vld [vmem:[#allocation2 + $0x84] ss:$16 sps:$4 sm:$0xff]  }
  0x2c   :  { %1626 = vmatpush1.bf16.msra.mxu0 %v5411_v6  ;;  %2078 = vmatpush1.bf16.msra.mxu1 %v5412_v7  ;;  %v5427_v17 = vld [vmem:[#allocation2 + $0x8c] ss:$16 sps:$4 sm:$0xff]   ;;  %v5429_v18 = vld [vmem:[#allocation2 + $0x80] ss:$16 sps:$4 sm:$0xff]   ;;  %v5430_v19 = vld [vmem:[#allocation2 + $0x88] ss:$16 sps:$4 sm:$0xff]  }
  0x2d   :  { %1627 = vmatprep.subr.bf16.mxu0 %v5413_v8  ;;  %2079 = vmatprep.subr.bf16.mxu1 %v5415_v9  ;;  %v5431_v20 = vld [vmem:[#allocation2 + $0xa4] ss:$16 sps:$4 sm:$0xff]   ;;  %v5433_v21 = vld [vmem:[#allocation2 + $0xac] ss:$16 sps:$4 sm:$0xff]   ;;  %v5435_v22 = vld [vmem:[#allocation2 + $0xa0] ss:$16 sps:$4 sm:$0xff]  }
  0x2e   :  { %v5436_v23 = vld [vmem:[#allocation2 + $0xa8] ss:$16 sps:$4 sm:$0xff]   ;;  %v5437_v24 = vld [vmem:[#allocation2 + $0xc4] ss:$16 sps:$4 sm:$0xff]   ;;  %v5439_v25 = vld [vmem:[#allocation2 + $0xcc] ss:$16 sps:$4 sm:$0xff]  }
  0x2f   :  { %v5441_v26 = vld [vmem:[#allocation2 + $0xc0] ss:$16 sps:$4 sm:$0xff]   ;;  %v5442_v27 = vld [vmem:[#allocation2 + $0xc8] ss:$16 sps:$4 sm:$0xff]   ;;  %v5443_v28 = vld [vmem:[#allocation2 + $0xe4] ss:$16 sps:$4 sm:$0xff]  }
  0x30   :  { %1628 = vmatpush1.bf16.msra.mxu0 %v5417_v10  ;;  %2080 = vmatpush1.bf16.msra.mxu1 %v5418_v11  ;;  %v5445_v29 = vld [vmem:[#allocation2 + $0xec] ss:$16 sps:$4 sm:$0xff]   ;;  %v5447_v30 = vld [vmem:[#allocation2 + $0xe0] ss:$16 sps:$4 sm:$0xff]   ;;  %v5448_v31 = vld [vmem:[#allocation2 + $0xe8] ss:$16 sps:$4 sm:$0xff]  }
  0x31   :  { %1629 = vmatprep.subr.bf16.mxu0 %v5419_v12  ;;  %2081 = vmatprep.subr.bf16.mxu1 %v5421_v13  ;;  %v5449_v32 = vld [vmem:[#allocation2 + $0x104] ss:$16 sps:$4 sm:$0xff]   ;;  %v5451_v33 = vld [vmem:[#allocation2 + $0x10c] ss:$16 sps:$4 sm:$0xff]   ;;  %v5453_v34 = vld [vmem:[#allocation2 + $0x100] ss:$16 sps:$4 sm:$0xff]  }
  0x32   :  { %v5454_v35 = vld [vmem:[#allocation2 + $0x108] ss:$16 sps:$4 sm:$0xff]   ;;  %v5455_v36 = vld [vmem:[#allocation2 + $0x124] ss:$16 sps:$4 sm:$0xff]   ;;  %v5457_v37 = vld [vmem:[#allocation2 + $0x12c] ss:$16 sps:$4 sm:$0xff]  }
  0x33   :  { %v5459_v38 = vld [vmem:[#allocation2 + $0x120] ss:$16 sps:$4 sm:$0xff]   ;;  %v5460_v39 = vld [vmem:[#allocation2 + $0x128] ss:$16 sps:$4 sm:$0xff]   ;;  %v5461_v40 = vld [vmem:[#allocation2 + $0x144] ss:$16 sps:$4 sm:$0xff]  }
  0x34   :  { %1630 = vmatpush1.bf16.msra.mxu0 %v5423_v14  ;;  %2082 = vmatpush1.bf16.msra.mxu1 %v5424_v15  ;;  %v5463_v41 = vld [vmem:[#allocation2 + $0x14c] ss:$16 sps:$4 sm:$0xff]   ;;  %v5465_v42 = vld [vmem:[#allocation2 + $0x140] ss:$16 sps:$4 sm:$0xff]   ;;  %v5466_v43 = vld [vmem:[#allocation2 + $0x148] ss:$16 sps:$4 sm:$0xff]  }
  0x35   :  { %1631 = vmatprep.subr.bf16.mxu0 %v5425_v16  ;;  %2083 = vmatprep.subr.bf16.mxu1 %v5427_v17  ;;  %v5467_v44 = vld [vmem:[#allocation2 + $0x164] ss:$16 sps:$4 sm:$0xff]   ;;  %v5469_v45 = vld [vmem:[#allocation2 + $0x16c] ss:$16 sps:$4 sm:$0xff]   ;;  %v5471_v46 = vld [vmem:[#allocation2 + $0x160] ss:$16 sps:$4 sm:$0xff]  }
  0x36   :  { %v5472_v47 = vld [vmem:[#allocation2 + $0x168] ss:$16 sps:$4 sm:$0xff]   ;;  %v5499_v48 = vld [vmem:[%s6708_s0 + $0x4] ss:$28 sps:$4 sm:$0xff]   ;;  %v5475_v50 = vld [vmem:[#allocation2 + $0x18c] ss:$16 sps:$4 sm:$0xff]  }
  0x37   :  { %v5473_v49 = vld [vmem:[#allocation2 + $0x184] ss:$16 sps:$4 sm:$0xff]   ;;  %1655 = vmatprep.mubr.bf16.mxu0 %v5499_v48  ;;  %2107 = vmatprep.mubr.bf16.mxu1 %v5499_v48  ;;  %v5477_v51 = vld [vmem:[#allocation2 + $0x180] ss:$16 sps:$4 sm:$0xff]   ;;  %v5478_v52 = vld [vmem:[#allocation2 + $0x188] ss:$16 sps:$4 sm:$0xff]  }
  0x38   :  { %1632 = vmatpush1.bf16.msra.mxu0 %v5429_v18  ;;  %2084 = vmatpush1.bf16.msra.mxu1 %v5430_v19  ;;  %v5479_v53 = vld [vmem:[#allocation2 + $0x1a4] ss:$16 sps:$4 sm:$0xff]   ;;  %v5481_v54 = vld [vmem:[#allocation2 + $0x1ac] ss:$16 sps:$4 sm:$0xff]   ;;  %v5483_v55 = vld [vmem:[#allocation2 + $0x1a0] ss:$16 sps:$4 sm:$0xff]  }
  0x39   :  { %1633 = vmatprep.subr.bf16.mxu0 %v5431_v20  ;;  %2085 = vmatprep.subr.bf16.mxu1 %v5433_v21  ;;  %v5484_v56 = vld [vmem:[#allocation2 + $0x1a8] ss:$16 sps:$4 sm:$0xff]   ;;  %v5485_v57 = vld [vmem:[#allocation2 + $0x1c4] ss:$16 sps:$4 sm:$0xff]   ;;  %v5487_v58 = vld [vmem:[#allocation2 + $0x1cc] ss:$16 sps:$4 sm:$0xff]  }
  0x3a   :  { %v5489_v59 = vld [vmem:[#allocation2 + $0x1c0] ss:$16 sps:$4 sm:$0xff]   ;;  %v5490_v60 = vld [vmem:[#allocation2 + $0x1c8] ss:$16 sps:$4 sm:$0xff]   ;;  %v5491_v61 = vld [vmem:[#allocation2 + $0x1e4] ss:$16 sps:$4 sm:$0xff]  }
  0x3b   :  { %v5493_v62 = vld [vmem:[#allocation2 + $0x1ec] ss:$16 sps:$4 sm:$0xff]   ;;  %v5495_v63 = vld [vmem:[#allocation2 + $0x1e0] ss:$16 sps:$4 sm:$0xff]   ;;  %v5496_v0 = vld [vmem:[#allocation2 + $0x1e8] ss:$16 sps:$4 sm:$0xff]  }
  0x3c   :  { %1634 = vmatpush1.bf16.msra.mxu0 %v5435_v22  ;;  %2086 = vmatpush1.bf16.msra.mxu1 %v5436_v23  ;;  %v5502_v1 = vld [vmem:[#allocation2 + $0x204] ss:$16 sps:$4 sm:$0xff]   ;;  %v5505_v2 = vld [vmem:[#allocation2 + $0x20c] ss:$16 sps:$4 sm:$0xff]   ;;  %v5500_v4 = vld [vmem:[#allocation2 + $0x200] ss:$16 sps:$4 sm:$0xff]  }
  0x3d   :  { %1635 = vmatprep.subr.bf16.mxu0 %v5437_v24  ;;  %2087 = vmatprep.subr.bf16.mxu1 %v5439_v25  ;;  %v5497_v3 = vld [vmem:[%s6708_s0] ss:$28 sps:$4 sm:$0xff]   ;;  %v5503_v5 = vld [vmem:[#allocation2 + $0x208] ss:$16 sps:$4 sm:$0xff]   ;;  %v5508_v6 = vld [vmem:[#allocation2 + $0x224] ss:$16 sps:$4 sm:$0xff]  }
  0x3e   :  { %v5511_v7 = vld [vmem:[#allocation2 + $0x22c] ss:$16 sps:$4 sm:$0xff]   ;;  %v5506_v9 = vld [vmem:[#allocation2 + $0x220] ss:$16 sps:$4 sm:$0xff]   ;;  %v5509_v10 = vld [vmem:[#allocation2 + $0x228] ss:$16 sps:$4 sm:$0xff]  }
  0x3f   :  { %v5512_v8 = vld [vmem:[%s6708_s0 + $0x3c] ss:$28 sps:$4 sm:$0xff]   ;;  %v5517_v11 = vld [vmem:[#allocation2 + $0x244] ss:$16 sps:$4 sm:$0xff]   ;;  %v5515_v14 = vld [vmem:[#allocation2 + $0x240] ss:$16 sps:$4 sm:$0xff]  }
  0x40   :  { %1636 = vmatpush1.bf16.msra.mxu0 %v5441_v26  ;;  %2088 = vmatpush1.bf16.msra.mxu1 %v5442_v27  ;;  %v5520_v12 = vld [vmem:[#allocation2 + $0x24c] ss:$16 sps:$4 sm:$0xff]   ;;  %v5514_v13 = vld [vmem:[%s6708_s0 + $0x38] ss:$28 sps:$4 sm:$0xff]   ;;  %v5521_v19 = vld [vmem:[#allocation2 + $0x260] ss:$16 sps:$4 sm:$0xff]  }
  0x41   :  { %1637 = vmatprep.subr.bf16.mxu0 %v5443_v28  ;;  %2089 = vmatprep.subr.bf16.mxu1 %v5445_v29  ;;  %v5518_v15 = vld [vmem:[#allocation2 + $0x248] ss:$16 sps:$4 sm:$0xff]   ;;  %v5523_v16 = vld [vmem:[#allocation2 + $0x264] ss:$16 sps:$4 sm:$0xff]   ;;  %v5526_v17 = vld [vmem:[#allocation2 + $0x26c] ss:$16 sps:$4 sm:$0xff]  }
  0x42   :  { %v5527_v18 = vld [vmem:[%s6708_s0 + $0x74] ss:$28 sps:$4 sm:$0xff]   ;;  %v5524_v20 = vld [vmem:[#allocation2 + $0x268] ss:$16 sps:$4 sm:$0xff]   ;;  %v5535_v22 = vld [vmem:[#allocation2 + $0x28c] ss:$16 sps:$4 sm:$0xff]  }
  0x43   :  { %v5532_v21 = vld [vmem:[#allocation2 + $0x284] ss:$16 sps:$4 sm:$0xff]   ;;  %v5529_v23 = vld [vmem:[%s6708_s0 + $0x70] ss:$28 sps:$4 sm:$0xff]   ;;  %v5533_v25 = vld [vmem:[#allocation2 + $0x288] ss:$16 sps:$4 sm:$0xff]  }
  0x44   :  { %1638 = vmatpush1.bf16.msra.mxu0 %v5447_v30  ;;  %2090 = vmatpush1.bf16.msra.mxu1 %v5448_v31  ;;  %v5530_v24 = vld [vmem:[#allocation2 + $0x280] ss:$16 sps:$4 sm:$0xff]   ;;  %v5538_v26 = vld [vmem:[#allocation2 + $0x2a4] ss:$16 sps:$4 sm:$0xff]   ;;  %v5541_v27 = vld [vmem:[#allocation2 + $0x2ac] ss:$16 sps:$4 sm:$0xff]  }
  0x45   :  { %1639 = vmatprep.subr.bf16.mxu0 %v5449_v32  ;;  %2091 = vmatprep.subr.bf16.mxu1 %v5451_v33  ;;  %v5542_v28 = vld [vmem:[%s6708_s0 + $0xac] ss:$28 sps:$4 sm:$0xff]   ;;  %v5536_v29 = vld [vmem:[#allocation2 + $0x2a0] ss:$16 sps:$4 sm:$0xff]   ;;  %v5547_v31 = vld [vmem:[#allocation2 + $0x2c4] ss:$16 sps:$4 sm:$0xff]  }
  0x46   :  { %v5539_v30 = vld [vmem:[#allocation2 + $0x2a8] ss:$16 sps:$4 sm:$0xff]   ;;  %v5550_v32 = vld [vmem:[#allocation2 + $0x2cc] ss:$16 sps:$4 sm:$0xff]   ;;  %vm1598_vm0 = vcmask 130048  }
  0x47   :  { %v5544_v33 = vld [vmem:[%s6708_s0 + $0xa8] ss:$28 sps:$4 sm:$0xff]   ;;  %v5572_v48 = vld [vmem:[%s6708_s0 + $0x11c] ss:$28 sps:$4 sm:$0xff]  }
  0x48   :  { %1640 = vmatpush1.bf16.msra.mxu0 %v5453_v34  ;;  %2092 = vmatpush1.bf16.msra.mxu1 %v5454_v35  ;;  %v5545_v34 = vld [vmem:[#allocation2 + $0x2c0] ss:$16 sps:$4 sm:$0xff]   ;;  %v5548_v35 = vld [vmem:[#allocation2 + $0x2c8] ss:$16 sps:$4 sm:$0xff]  }
  0x49   :  { %1641 = vmatprep.subr.bf16.mxu0 %v5455_v36  ;;  %2093 = vmatprep.subr.bf16.mxu1 %v5457_v37  ;;  %v5553_v36 = vld [vmem:[#allocation2 + $0x2e4] ss:$16 sps:$4 sm:$0xff]   ;;  %v5556_v37 = vld [vmem:[#allocation2 + $0x2ec] ss:$16 sps:$4 sm:$0xff]  }
  0x4c   :  { %1642 = vmatpush1.bf16.msra.mxu0 %v5459_v38  ;;  %2094 = vmatpush1.bf16.msra.mxu1 %v5460_v39  ;;  %v5557_v38 = vld [vmem:[%s6708_s0 + $0xe4] ss:$28 sps:$4 sm:$0xff]  }
  0x4d   :  { %1643 = vmatprep.subr.bf16.mxu0 %v5461_v40  ;;  %2095 = vmatprep.subr.bf16.mxu1 %v5463_v41  ;;  %v5551_v39 = vld [vmem:[#allocation2 + $0x2e0] ss:$16 sps:$4 sm:$0xff]   ;;  %v5554_v40 = vld [vmem:[#allocation2 + $0x2e8] ss:$16 sps:$4 sm:$0xff]   ;;  %v5562_v41 = vld [vmem:[#allocation2 + $0x304] ss:$16 sps:$4 sm:$0xff]  }
  0x50   :  { %1644 = vmatpush1.bf16.msra.mxu0 %v5465_v42  ;;  %2096 = vmatpush1.bf16.msra.mxu1 %v5466_v43  ;;  %v5565_v42 = vld [vmem:[#allocation2 + $0x30c] ss:$16 sps:$4 sm:$0xff]  }
  0x51   :  { %1645 = vmatprep.subr.bf16.mxu0 %v5467_v44  ;;  %2097 = vmatprep.subr.bf16.mxu1 %v5469_v45  ;;  %v5559_v43 = vld [vmem:[%s6708_s0 + $0xe0] ss:$28 sps:$4 sm:$0xff]   ;;  %v5563_v45 = vld [vmem:[#allocation2 + $0x308] ss:$16 sps:$4 sm:$0xff]  }
  0x52   :  { %v5560_v44 = vld [vmem:[#allocation2 + $0x300] ss:$16 sps:$4 sm:$0xff]  }
  0x54   :  { %1646 = vmatpush1.bf16.msra.mxu0 %v5471_v46  ;;  %2098 = vmatpush1.bf16.msra.mxu1 %v5472_v47  ;;  %v5568_v46 = vld [vmem:[#allocation2 + $0x324] ss:$16 sps:$4 sm:$0xff]   ;;  %v5571_v47 = vld [vmem:[#allocation2 + $0x32c] ss:$16 sps:$4 sm:$0xff]  }
  0x55   :  { %1647 = vmatprep.subr.bf16.mxu0 %v5473_v49  ;;  %2099 = vmatprep.subr.bf16.mxu1 %v5475_v50  ;;  %v5566_v49 = vld [vmem:[#allocation2 + $0x320] ss:$16 sps:$4 sm:$0xff]   ;;  %v5569_v50 = vld [vmem:[#allocation2 + $0x328] ss:$16 sps:$4 sm:$0xff]  }
  0x58   :  { %1648 = vmatpush1.bf16.msra.mxu0 %v5477_v51  ;;  %2100 = vmatpush1.bf16.msra.mxu1 %v5478_v52  ;;  %v5577_v51 = vld [vmem:[#allocation2 + $0x344] ss:$16 sps:$4 sm:$0xff]   ;;  %v5580_v52 = vld [vmem:[#allocation2 + $0x34c] ss:$16 sps:$4 sm:$0xff]  }
  0x59   :  { %1649 = vmatprep.subr.bf16.mxu0 %v5479_v53  ;;  %2101 = vmatprep.subr.bf16.mxu1 %v5481_v54  ;;  %v5574_v53 = vld [vmem:[%s6708_s0 + $0x118] ss:$28 sps:$4 sm:$0xff]   ;;  %v5575_v54 = vld [vmem:[#allocation2 + $0x340] ss:$16 sps:$4 sm:$0xff]  }
  0x5c   :  { %1650 = vmatpush1.bf16.msra.mxu0 %v5483_v55  ;;  %2102 = vmatpush1.bf16.msra.mxu1 %v5484_v56  ;;  %v5578_v55 = vld [vmem:[#allocation2 + $0x348] ss:$16 sps:$4 sm:$0xff]   ;;  %v5583_v56 = vld [vmem:[#allocation2 + $0x364] ss:$16 sps:$4 sm:$0xff]  }
  0x5d   :  { %1651 = vmatprep.subr.bf16.mxu0 %v5485_v57  ;;  %2103 = vmatprep.subr.bf16.mxu1 %v5487_v58  ;;  %v5586_v57 = vld [vmem:[#allocation2 + $0x36c] ss:$16 sps:$4 sm:$0xff]   ;;  %v5587_v58 = vld [vmem:[%s6708_s0 + $0x154] ss:$28 sps:$4 sm:$0xff]  }
  0x60   :  { %1652 = vmatpush1.bf16.msra.mxu0 %v5489_v59  ;;  %2104 = vmatpush1.bf16.msra.mxu1 %v5490_v60  ;;  %v5581_v59 = vld [vmem:[#allocation2 + $0x360] ss:$16 sps:$4 sm:$0xff]   ;;  %v5584_v60 = vld [vmem:[#allocation2 + $0x368] ss:$16 sps:$4 sm:$0xff]  }
  0x61   :  { %1653 = vmatprep.subr.bf16.mxu0 %v5491_v61  ;;  %2105 = vmatprep.subr.bf16.mxu1 %v5493_v62  ;;  %v5592_v61 = vld [vmem:[#allocation2 + $0x384] ss:$16 sps:$4 sm:$0xff]   ;;  %v5595_v62 = vld [vmem:[#allocation2 + $0x38c] ss:$16 sps:$4 sm:$0xff]  }
  0x64   :  { %1654 = vmatpush1.bf16.msra.mxu0 %v5495_v63  ;;  %2106 = vmatpush1.bf16.msra.mxu1 %v5496_v0  ;;  %v5589_v63 = vld [vmem:[%s6708_s0 + $0x150] ss:$28 sps:$4 sm:$0xff]  }
  0x65   :  { %1736 = vmatprep.subr.bf16.mxu0 %v5502_v1  ;;  %2188 = vmatprep.subr.bf16.mxu1 %v5505_v2  ;;  %v5590_v0 = vld [vmem:[#allocation2 + $0x380] ss:$16 sps:$4 sm:$0xff]   ;;  %v5593_v1 = vld [vmem:[#allocation2 + $0x388] ss:$16 sps:$4 sm:$0xff]   ;;  %v5598_v2 = vld [vmem:[#allocation2 + $0x3a4] ss:$16 sps:$4 sm:$0xff]  }
  0x67   :  { %1656 = vmatmul.mubr.bf16.vlgmr.msra.gmra.mrb[0].mxu0 %v5497_v3  ;;  %2108 = vmatmul.mubr.bf16.vlgmr.msra.gmra.mrb[0].mxu1 %v5497_v3  ;;  %v5601_v3 = vld [vmem:[#allocation2 + $0x3ac] ss:$16 sps:$4 sm:$0xff]  }
  0x68   :  { %1737 = vmatpush1.bf16.msra.mxu0 %v5500_v4  ;;  %2189 = vmatpush1.bf16.msra.mxu1 %v5503_v5  ;;  %v5602_v4 = vld [vmem:[%s6708_s0 + $0x18c] ss:$28 sps:$4 sm:$0xff]   ;;  %v5596_v5 = vld [vmem:[#allocation2 + $0x3a0] ss:$16 sps:$4 sm:$0xff]  }
  0x69   :  { %1738 = vmatprep.subr.bf16.mxu0 %v5508_v6  ;;  %2190 = vmatprep.subr.bf16.mxu1 %v5511_v7  ;;  %v5599_v6 = vld [vmem:[#allocation2 + $0x3a8] ss:$16 sps:$4 sm:$0xff]   ;;  %v5607_v7 = vld [vmem:[#allocation2 + $0x3c4] ss:$16 sps:$4 sm:$0xff]  }
  0x6a   :  { %1665 = vmatprep.mubr.bf16.mxu0 %v5512_v8  ;;  %2117 = vmatprep.mubr.bf16.mxu1 %v5512_v8  ;;  %v5610_v8 = vld [vmem:[#allocation2 + $0x3cc] ss:$16 sps:$4 sm:$0xff]  }
  0x6c   :  { %1739 = vmatpush1.bf16.msra.mxu0 %v5506_v9  ;;  %2191 = vmatpush1.bf16.msra.mxu1 %v5509_v10  ;;  %v5604_v9 = vld [vmem:[%s6708_s0 + $0x188] ss:$28 sps:$4 sm:$0xff]   ;;  %v5605_v10 = vld [vmem:[#allocation2 + $0x3c0] ss:$16 sps:$4 sm:$0xff]  }
  0x6d   :  { %1740 = vmatprep.subr.bf16.mxu0 %v5517_v11  ;;  %2192 = vmatprep.subr.bf16.mxu1 %v5520_v12  ;;  %v5608_v11 = vld [vmem:[#allocation2 + $0x3c8] ss:$16 sps:$4 sm:$0xff]   ;;  %v5613_v12 = vld [vmem:[#allocation2 + $0x3e4] ss:$16 sps:$4 sm:$0xff]  }
  0x6f   :  { %1666 = vmatmul.mubr.bf16.gmra.mrb[4].mxu0 %v5514_v13  ;;  %2118 = vmatmul.mubr.bf16.gmra.mrb[4].mxu1 %v5514_v13  ;;  %v5616_v13 = vld [vmem:[#allocation2 + $0x3ec] ss:$16 sps:$4 sm:$0xff]  }
  0x70   :  { %1741 = vmatpush1.bf16.msra.mxu0 %v5515_v14  ;;  %2193 = vmatpush1.bf16.msra.mxu1 %v5518_v15  ;;  %v5619_v14 = vld [vmem:[%s6708_s0 + $0xc] ss:$28 sps:$4 sm:$0xff]   ;;  %v5611_v15 = vld [vmem:[#allocation2 + $0x3e0] ss:$16 sps:$4 sm:$0xff]  }
  0x71   :  { %1742 = vmatprep.subr.bf16.mxu0 %v5523_v16  ;;  %2194 = vmatprep.subr.bf16.mxu1 %v5526_v17  ;;  %v5614_v16 = vld [vmem:[#allocation2 + $0x3e8] ss:$16 sps:$4 sm:$0xff]   ;;  %v5622_v17 = vld [vmem:[#allocation2 + $0x404] ss:$16 sps:$4 sm:$0xff]  }
  0x72   :  { %1675 = vmatprep.mubr.bf16.mxu0 %v5527_v18  ;;  %2127 = vmatprep.mubr.bf16.mxu1 %v5527_v18  ;;  %v5625_v18 = vld [vmem:[#allocation2 + $0x40c] ss:$16 sps:$4 sm:$0xff]  }
  0x74   :  { %1743 = vmatpush1.bf16.msra.mxu0 %v5521_v19  ;;  %2195 = vmatpush1.bf16.msra.mxu1 %v5524_v20  ;;  %v5617_v19 = vld [vmem:[%s6708_s0 + $0x8] ss:$28 sps:$4 sm:$0xff]   ;;  %v5620_v20 = vld [vmem:[#allocation2 + $0x400] ss:$16 sps:$4 sm:$0xff]  }
  0x75   :  { %1744 = vmatprep.subr.bf16.mxu0 %v5532_v21  ;;  %2196 = vmatprep.subr.bf16.mxu1 %v5535_v22  ;;  %v5623_v21 = vld [vmem:[#allocation2 + $0x408] ss:$16 sps:$4 sm:$0xff]   ;;  %v5628_v22 = vld [vmem:[#allocation2 + $0x424] ss:$16 sps:$4 sm:$0xff]  }
  0x77   :  { %1676 = vmatmul.mubr.bf16.gmra.mrb[8].mxu0 %v5529_v23  ;;  %2128 = vmatmul.mubr.bf16.gmra.mrb[8].mxu1 %v5529_v23  ;;  %v5631_v23 = vld [vmem:[#allocation2 + $0x42c] ss:$16 sps:$4 sm:$0xff]  }
  0x78   :  { %1745 = vmatpush1.bf16.msra.mxu0 %v5530_v24  ;;  %2197 = vmatpush1.bf16.msra.mxu1 %v5533_v25  ;;  %v5632_v24 = vld [vmem:[%s6708_s0 + $0x44] ss:$28 sps:$4 sm:$0xff]  }
  0x79   :  { %1746 = vmatprep.subr.bf16.mxu0 %v5538_v26  ;;  %2198 = vmatprep.subr.bf16.mxu1 %v5541_v27  ;;  %v5626_v25 = vld [vmem:[#allocation2 + $0x420] ss:$16 sps:$4 sm:$0xff]   ;;  %v5629_v26 = vld [vmem:[#allocation2 + $0x428] ss:$16 sps:$4 sm:$0xff]   ;;  %v5637_v27 = vld [vmem:[#allocation2 + $0x444] ss:$16 sps:$4 sm:$0xff]  }
  0x7a   :  { %1685 = vmatprep.mubr.bf16.mxu0 %v5542_v28  ;;  %2137 = vmatprep.mubr.bf16.mxu1 %v5542_v28  ;;  %v5640_v28 = vld [vmem:[#allocation2 + $0x44c] ss:$16 sps:$4 sm:$0xff]  }
  0x7c   :  { %1747 = vmatpush1.bf16.msra.mxu0 %v5536_v29  ;;  %2199 = vmatpush1.bf16.msra.mxu1 %v5539_v30  ;;  %v5634_v29 = vld [vmem:[%s6708_s0 + $0x40] ss:$28 sps:$4 sm:$0xff]  }
  0x7d   :  { %1748 = vmatprep.subr.bf16.mxu0 %v5547_v31  ;;  %2200 = vmatprep.subr.bf16.mxu1 %v5550_v32  ;;  %v5635_v30 = vld [vmem:[#allocation2 + $0x440] ss:$16 sps:$4 sm:$0xff]   ;;  %v5638_v31 = vld [vmem:[#allocation2 + $0x448] ss:$16 sps:$4 sm:$0xff]   ;;  %v5643_v32 = vld [vmem:[#allocation2 + $0x464] ss:$16 sps:$4 sm:$0xff]  }
  0x7f   :  { %1686 = vmatmul.mubr.bf16.gmra.mrb[12].mxu0 %v5544_v33  ;;  %2138 = vmatmul.mubr.bf16.gmra.mrb[12].mxu1 %v5544_v33  ;;  %v5646_v33 = vld [vmem:[#allocation2 + $0x46c] ss:$16 sps:$4 sm:$0xff]  }
  0x80   :  { %1749 = vmatpush1.bf16.msra.mxu0 %v5545_v34  ;;  %2201 = vmatpush1.bf16.msra.mxu1 %v5548_v35  ;;  %v5647_v34 = vld [vmem:[%s6708_s0 + $0x7c] ss:$28 sps:$4 sm:$0xff]   ;;  %v5641_v35 = vld [vmem:[#allocation2 + $0x460] ss:$16 sps:$4 sm:$0xff]  }
  0x81   :  { %1750 = vmatprep.subr.bf16.mxu0 %v5553_v36  ;;  %2202 = vmatprep.subr.bf16.mxu1 %v5556_v37  ;;  %v5644_v36 = vld [vmem:[#allocation2 + $0x468] ss:$16 sps:$4 sm:$0xff]   ;;  %v5652_v37 = vld [vmem:[#allocation2 + $0x484] ss:$16 sps:$4 sm:$0xff]  }
  0x82   :  { %1695 = vmatprep.mubr.bf16.mxu0 %v5557_v38  ;;  %2147 = vmatprep.mubr.bf16.mxu1 %v5557_v38  ;;  %v5655_v38 = vld [vmem:[#allocation2 + $0x48c] ss:$16 sps:$4 sm:$0xff]  }
  0x84   :  { %1751 = vmatpush1.bf16.msra.mxu0 %v5551_v39  ;;  %2203 = vmatpush1.bf16.msra.mxu1 %v5554_v40  ;;  %v5649_v39 = vld [vmem:[%s6708_s0 + $0x78] ss:$28 sps:$4 sm:$0xff]   ;;  %v5650_v40 = vld [vmem:[#allocation2 + $0x480] ss:$16 sps:$4 sm:$0xff]  }
  0x85   :  { %1752 = vmatprep.subr.bf16.mxu0 %v5562_v41  ;;  %2204 = vmatprep.subr.bf16.mxu1 %v5565_v42  ;;  %v5653_v41 = vld [vmem:[#allocation2 + $0x488] ss:$16 sps:$4 sm:$0xff]   ;;  %v5658_v42 = vld [vmem:[#allocation2 + $0x4a4] ss:$16 sps:$4 sm:$0xff]  }
  0x87   :  { %1696 = vmatmul.mubr.bf16.gmra.mrb[16].mxu0 %v5559_v43  ;;  %2148 = vmatmul.mubr.bf16.gmra.mrb[16].mxu1 %v5559_v43  ;;  %v5661_v43 = vld [vmem:[#allocation2 + $0x4ac] ss:$16 sps:$4 sm:$0xff]  }
  0x88   :  { %1753 = vmatpush1.bf16.msra.mxu0 %v5560_v44  ;;  %2205 = vmatpush1.bf16.msra.mxu1 %v5563_v45  ;;  %v5662_v44 = vld [vmem:[%s6708_s0 + $0xb4] ss:$28 sps:$4 sm:$0xff]  }
  0x89   :  { %1754 = vmatprep.subr.bf16.mxu0 %v5568_v46  ;;  %2206 = vmatprep.subr.bf16.mxu1 %v5571_v47  ;;  %v5656_v45 = vld [vmem:[#allocation2 + $0x4a0] ss:$16 sps:$4 sm:$0xff]   ;;  %v5659_v46 = vld [vmem:[#allocation2 + $0x4a8] ss:$16 sps:$4 sm:$0xff]   ;;  %v5667_v47 = vld [vmem:[#allocation2 + $0x4c4] ss:$16 sps:$4 sm:$0xff]  }
  0x8a   :  { %1705 = vmatprep.mubr.bf16.mxu0 %v5572_v48  ;;  %2157 = vmatprep.mubr.bf16.mxu1 %v5572_v48  ;;  %v5670_v48 = vld [vmem:[#allocation2 + $0x4cc] ss:$16 sps:$4 sm:$0xff]  }
  0x8c   :  { %1755 = vmatpush1.bf16.msra.mxu0 %v5566_v49  ;;  %2207 = vmatpush1.bf16.msra.mxu1 %v5569_v50  ;;  %v5664_v49 = vld [vmem:[%s6708_s0 + $0xb0] ss:$28 sps:$4 sm:$0xff]  }
  0x8d   :  { %1756 = vmatprep.subr.bf16.mxu0 %v5577_v51  ;;  %2208 = vmatprep.subr.bf16.mxu1 %v5580_v52  ;;  %v5665_v50 = vld [vmem:[#allocation2 + $0x4c0] ss:$16 sps:$4 sm:$0xff]   ;;  %v5668_v51 = vld [vmem:[#allocation2 + $0x4c8] ss:$16 sps:$4 sm:$0xff]   ;;  %v5673_v52 = vld [vmem:[#allocation2 + $0x4e4] ss:$16 sps:$4 sm:$0xff]  }
  0x8f   :  { %1706 = vmatmul.mubr.bf16.gmra.mrb[20].mxu0 %v5574_v53  ;;  %2158 = vmatmul.mubr.bf16.gmra.mrb[20].mxu1 %v5574_v53  ;;  %v5676_v53 = vld [vmem:[#allocation2 + $0x4ec] ss:$16 sps:$4 sm:$0xff]  }
  0x90   :  { %1757 = vmatpush1.bf16.msra.mxu0 %v5575_v54  ;;  %2209 = vmatpush1.bf16.msra.mxu1 %v5578_v55  ;;  %v5677_v54 = vld [vmem:[%s6708_s0 + $0xec] ss:$28 sps:$4 sm:$0xff]   ;;  %v5671_v55 = vld [vmem:[#allocation2 + $0x4e0] ss:$16 sps:$4 sm:$0xff]  }
  0x91   :  { %1758 = vmatprep.subr.bf16.mxu0 %v5583_v56  ;;  %2210 = vmatprep.subr.bf16.mxu1 %v5586_v57  ;;  %v5674_v56 = vld [vmem:[#allocation2 + $0x4e8] ss:$16 sps:$4 sm:$0xff]   ;;  %v5682_v57 = vld [vmem:[#allocation2 + $0x504] ss:$16 sps:$4 sm:$0xff]  }
  0x92   :  { %1715 = vmatprep.mubr.bf16.mxu0 %v5587_v58  ;;  %2167 = vmatprep.mubr.bf16.mxu1 %v5587_v58  ;;  %v5685_v58 = vld [vmem:[#allocation2 + $0x50c] ss:$16 sps:$4 sm:$0xff]  }
  0x94   :  { %1759 = vmatpush1.bf16.msra.mxu0 %v5581_v59  ;;  %2211 = vmatpush1.bf16.msra.mxu1 %v5584_v60  ;;  %v5679_v59 = vld [vmem:[%s6708_s0 + $0xe8] ss:$28 sps:$4 sm:$0xff]   ;;  %v5680_v60 = vld [vmem:[#allocation2 + $0x500] ss:$16 sps:$4 sm:$0xff]  }
  0x95   :  { %1760 = vmatprep.subr.bf16.mxu0 %v5592_v61  ;;  %2212 = vmatprep.subr.bf16.mxu1 %v5595_v62  ;;  %v5683_v61 = vld [vmem:[#allocation2 + $0x508] ss:$16 sps:$4 sm:$0xff]   ;;  %v5688_v62 = vld [vmem:[#allocation2 + $0x524] ss:$16 sps:$4 sm:$0xff]  }
  0x97   :  { %1716 = vmatmul.mubr.bf16.gmra.mrb[24].mxu0 %v5589_v63  ;;  %2168 = vmatmul.mubr.bf16.gmra.mrb[24].mxu1 %v5589_v63  ;;  %v5691_v63 = vld [vmem:[#allocation2 + $0x52c] ss:$16 sps:$4 sm:$0xff]  }
  0x98   :  { %1761 = vmatpush1.bf16.msra.mxu0 %v5590_v0  ;;  %2213 = vmatpush1.bf16.msra.mxu1 %v5593_v1  ;;  %v5686_v0 = vld [vmem:[#allocation2 + $0x520] ss:$16 sps:$4 sm:$0xff]  }
  0x99   :  { %1762 = vmatprep.subr.bf16.mxu0 %v5598_v2  ;;  %2214 = vmatprep.subr.bf16.mxu1 %v5601_v3  ;;  %v5692_v1 = vld [vmem:[%s6708_s0 + $0x124] ss:$28 sps:$4 sm:$0xff]   ;;  %v5689_v2 = vld [vmem:[#allocation2 + $0x528] ss:$16 sps:$4 sm:$0xff]  }
  0x9a   :  { %1725 = vmatprep.mubr.bf16.mxu0 %v5602_v4  ;;  %2177 = vmatprep.mubr.bf16.mxu1 %v5602_v4  ;;  %v5697_v3 = vld [vmem:[#allocation2 + $0x544] ss:$16 sps:$4 sm:$0xff]   ;;  %v5694_v4 = vld [vmem:[%s6708_s0 + $0x120] ss:$28 sps:$4 sm:$0xff]  }
  0x9c   :  { %1763 = vmatpush1.bf16.msra.mxu0 %v5596_v5  ;;  %2215 = vmatpush1.bf16.msra.mxu1 %v5599_v6  ;;  %v5700_v5 = vld [vmem:[#allocation2 + $0x54c] ss:$16 sps:$4 sm:$0xff]   ;;  %v5695_v6 = vld [vmem:[#allocation2 + $0x540] ss:$16 sps:$4 sm:$0xff]  }
  0x9d   :  { %1764 = vmatprep.subr.bf16.mxu0 %v5607_v7  ;;  %2216 = vmatprep.subr.bf16.mxu1 %v5610_v8  ;;  %v5698_v7 = vld [vmem:[#allocation2 + $0x548] ss:$16 sps:$4 sm:$0xff]   ;;  %v5703_v8 = vld [vmem:[#allocation2 + $0x564] ss:$16 sps:$4 sm:$0xff]  }
  0x9f   :  { %1726 = vmatmul.mubr.bf16.gmra.mrb[28].mxu0 %v5604_v9  ;;  %2178 = vmatmul.mubr.bf16.gmra.mrb[28].mxu1 %v5604_v9  ;;  %v5706_v9 = vld [vmem:[#allocation2 + $0x56c] ss:$16 sps:$4 sm:$0xff]  }
  0xa0   :  { %1765 = vmatpush1.bf16.msra.mxu0 %v5605_v10  ;;  %2217 = vmatpush1.bf16.msra.mxu1 %v5608_v11  ;;  %v5707_v10 = vld [vmem:[%s6708_s0 + $0x15c] ss:$28 sps:$4 sm:$0xff]   ;;  %v5701_v11 = vld [vmem:[#allocation2 + $0x560] ss:$16 sps:$4 sm:$0xff]  }
  0xa1   :  { %1766 = vmatprep.subr.bf16.mxu0 %v5613_v12  ;;  %2218 = vmatprep.subr.bf16.mxu1 %v5616_v13  ;;  %v5704_v12 = vld [vmem:[#allocation2 + $0x568] ss:$16 sps:$4 sm:$0xff]   ;;  %v5712_v13 = vld [vmem:[#allocation2 + $0x584] ss:$16 sps:$4 sm:$0xff]  }
  0xa2   :  { %1768 = vmatprep.mubr.bf16.mxu0 %v5619_v14  ;;  %2220 = vmatprep.mubr.bf16.mxu1 %v5619_v14  ;;  %v5715_v14 = vld [vmem:[#allocation2 + $0x58c] ss:$16 sps:$4 sm:$0xff]  }
  0xa4   :  { %1767 = vmatpush1.bf16.msra.mxu0 %v5611_v15  ;;  %2219 = vmatpush1.bf16.msra.mxu1 %v5614_v16  ;;  %v5709_v15 = vld [vmem:[%s6708_s0 + $0x158] ss:$28 sps:$4 sm:$0xff]   ;;  %v5710_v16 = vld [vmem:[#allocation2 + $0x580] ss:$16 sps:$4 sm:$0xff]  }
  0xa5   :  { %1849 = vmatprep.subr.bf16.mxu0 %v5622_v17  ;;  %2301 = vmatprep.subr.bf16.mxu1 %v5625_v18  ;;  %v5713_v17 = vld [vmem:[#allocation2 + $0x588] ss:$16 sps:$4 sm:$0xff]   ;;  %v5718_v18 = vld [vmem:[#allocation2 + $0x5a4] ss:$16 sps:$4 sm:$0xff]  }
  0xa7   :  { %1769 = vmatmul.mubr.bf16.vlgmr.msra.gmra.mrb[0].mxu0 %v5617_v19  ;;  %2221 = vmatmul.mubr.bf16.vlgmr.msra.gmra.mrb[0].mxu1 %v5617_v19  ;;  %v5721_v19 = vld [vmem:[#allocation2 + $0x5ac] ss:$16 sps:$4 sm:$0xff]  }
  0xa8   :  { %1850 = vmatpush1.bf16.msra.mxu0 %v5620_v20  ;;  %2302 = vmatpush1.bf16.msra.mxu1 %v5623_v21  ;;  %v5722_v20 = vld [vmem:[%s6708_s0 + $0x194] ss:$28 sps:$4 sm:$0xff]  }
  0xa9   :  { %1851 = vmatprep.subr.bf16.mxu0 %v5628_v22  ;;  %2303 = vmatprep.subr.bf16.mxu1 %v5631_v23  ;;  %v5716_v21 = vld [vmem:[#allocation2 + $0x5a0] ss:$16 sps:$4 sm:$0xff]   ;;  %v5719_v22 = vld [vmem:[#allocation2 + $0x5a8] ss:$16 sps:$4 sm:$0xff]   ;;  %v5727_v23 = vld [vmem:[#allocation2 + $0x5c4] ss:$16 sps:$4 sm:$0xff]  }
  0xaa   :  { %1778 = vmatprep.mubr.bf16.mxu0 %v5632_v24  ;;  %2230 = vmatprep.mubr.bf16.mxu1 %v5632_v24  ;;  %v5730_v24 = vld [vmem:[#allocation2 + $0x5cc] ss:$16 sps:$4 sm:$0xff]  }
  0xac   :  { %1852 = vmatpush1.bf16.msra.mxu0 %v5626_v25  ;;  %2304 = vmatpush1.bf16.msra.mxu1 %v5629_v26  ;;  %v5724_v25 = vld [vmem:[%s6708_s0 + $0x190] ss:$28 sps:$4 sm:$0xff]  }
  0xad   :  { %1853 = vmatprep.subr.bf16.mxu0 %v5637_v27  ;;  %2305 = vmatprep.subr.bf16.mxu1 %v5640_v28  ;;  %v5725_v26 = vld [vmem:[#allocation2 + $0x5c0] ss:$16 sps:$4 sm:$0xff]   ;;  %v5728_v27 = vld [vmem:[#allocation2 + $0x5c8] ss:$16 sps:$4 sm:$0xff]   ;;  %v5733_v28 = vld [vmem:[#allocation2 + $0x5e4] ss:$16 sps:$4 sm:$0xff]  }
  0xaf   :  { %1779 = vmatmul.mubr.bf16.gmra.mrb[4].mxu0 %v5634_v29  ;;  %2231 = vmatmul.mubr.bf16.gmra.mrb[4].mxu1 %v5634_v29  ;;  %v5736_v29 = vld [vmem:[#allocation2 + $0x5ec] ss:$16 sps:$4 sm:$0xff]  }
  0xb0   :  { %1854 = vmatpush1.bf16.msra.mxu0 %v5635_v30  ;;  %2306 = vmatpush1.bf16.msra.mxu1 %v5638_v31  ;;  %v5739_v30 = vld [vmem:[%s6708_s0 + $0x14] ss:$28 sps:$4 sm:$0xff]  }
  0xb1   :  { %1855 = vmatprep.subr.bf16.mxu0 %v5643_v32  ;;  %2307 = vmatprep.subr.bf16.mxu1 %v5646_v33  ;;  %v5731_v31 = vld [vmem:[#allocation2 + $0x5e0] ss:$16 sps:$4 sm:$0xff]   ;;  %v5734_v32 = vld [vmem:[#allocation2 + $0x5e8] ss:$16 sps:$4 sm:$0xff]   ;;  %v5742_v33 = vld [vmem:[#allocation2 + $0x604] ss:$16 sps:$4 sm:$0xff]  }
  0xb2   :  { %1788 = vmatprep.mubr.bf16.mxu0 %v5647_v34  ;;  %2240 = vmatprep.mubr.bf16.mxu1 %v5647_v34  ;;  %v5766_v34 = vld [vmem:[#allocation2 + $0x60c] ss:$16 sps:$4 sm:$0xff]  }
  0xb4   :  { %1856 = vmatpush1.bf16.msra.mxu0 %v5641_v35  ;;  %2308 = vmatpush1.bf16.msra.mxu1 %v5644_v36  ;;  %v5737_v35 = vld [vmem:[%s6708_s0 + $0x10] ss:$28 sps:$4 sm:$0xff]  }
  0xb5   :  { %1857 = vmatprep.subr.bf16.mxu0 %v5652_v37  ;;  %2309 = vmatprep.subr.bf16.mxu1 %v5655_v38  ;;  %v5740_v36 = vld [vmem:[#allocation2 + $0x600] ss:$16 sps:$4 sm:$0xff]   ;;  %v5743_v37 = vld [vmem:[%s6708_s0 + $0x4c] ss:$28 sps:$4 sm:$0xff]  }
  0xb6   :  { %v5764_v38 = vld [vmem:[#allocation2 + $0x608] ss:$16 sps:$4 sm:$0xff]  }
  0xb7   :  { %1789 = vmatmul.mubr.bf16.gmra.mrb[8].mxu0 %v5649_v39  ;;  %2241 = vmatmul.mubr.bf16.gmra.mrb[8].mxu1 %v5649_v39  ;;  %v5777_v39 = vld [vmem:[#allocation5 + $0x4] ss:$16 sps:$4 sm:$0xff]  }
  0xb8   :  { %1858 = vmatpush1.bf16.msra.mxu0 %v5650_v40  ;;  %2310 = vmatpush1.bf16.msra.mxu1 %v5653_v41  ;;  %v5780_v40 = vld [vmem:[#allocation5 + $0xc] ss:$16 sps:$4 sm:$0xff]   ;;  %v5745_v41 = vld [vmem:[%s6708_s0 + $0x48] ss:$28 sps:$4 sm:$0xff]  }
  0xb9   :  { %1859 = vmatprep.subr.bf16.mxu0 %v5658_v42  ;;  %2311 = vmatprep.subr.bf16.mxu1 %v5661_v43  ;;  %v5746_v42 = vld [vmem:[%s6708_s0 + $0x84] ss:$28 sps:$4 sm:$0xff]  }
  0xba   :  { %1798 = vmatprep.mubr.bf16.mxu0 %v5662_v44  ;;  %2250 = vmatprep.mubr.bf16.mxu1 %v5662_v44  ;;  %v5748_v43 = vld [vmem:[%s6708_s0 + $0x80] ss:$28 sps:$4 sm:$0xff]  }
  0xbb   :  { %v5749_v44 = vld [vmem:[%s6708_s0 + $0xbc] ss:$28 sps:$4 sm:$0xff]  }
  0xbc   :  { %1860 = vmatpush1.bf16.msra.mxu0 %v5656_v45  ;;  %2312 = vmatpush1.bf16.msra.mxu1 %v5659_v46  ;;  %v5751_v45 = vld [vmem:[%s6708_s0 + $0xb8] ss:$28 sps:$4 sm:$0xff]  }
  0xbd   :  { %1861 = vmatprep.subr.bf16.mxu0 %v5667_v47  ;;  %2313 = vmatprep.subr.bf16.mxu1 %v5670_v48  ;;  %v5752_v46 = vld [vmem:[%s6708_s0 + $0xf4] ss:$28 sps:$4 sm:$0xff]   ;;  %v5755_v48 = vld [vmem:[%s6708_s0 + $0x12c] ss:$28 sps:$4 sm:$0xff]  }
  0xbe   :  { %v5754_v47 = vld [vmem:[%s6708_s0 + $0xf0] ss:$28 sps:$4 sm:$0xff]  }
  0xbf   :  { %1799 = vmatmul.mubr.bf16.gmra.mrb[12].mxu0 %v5664_v49  ;;  %2251 = vmatmul.mubr.bf16.gmra.mrb[12].mxu1 %v5664_v49  ;;  %v5757_v49 = vld [vmem:[%s6708_s0 + $0x128] ss:$28 sps:$4 sm:$0xff]  }
  0xc0   :  { %1862 = vmatpush1.bf16.msra.mxu0 %v5665_v50  ;;  %2314 = vmatpush1.bf16.msra.mxu1 %v5668_v51  ;;  %v5758_v50 = vld [vmem:[%s6708_s0 + $0x164] ss:$28 sps:$4 sm:$0xff]  }
  0xc1   :  { %1863 = vmatprep.subr.bf16.mxu0 %v5673_v52  ;;  %2315 = vmatprep.subr.bf16.mxu1 %v5676_v53  ;;  %v5760_v51 = vld [vmem:[%s6708_s0 + $0x160] ss:$28 sps:$4 sm:$0xff]   ;;  %v5763_v53 = vld [vmem:[%s6708_s0 + $0x198] ss:$28 sps:$4 sm:$0xff]  }
  0xc2   :  { %1808 = vmatprep.mubr.bf16.mxu0 %v5677_v54  ;;  %2260 = vmatprep.mubr.bf16.mxu1 %v5677_v54  ;;  %v5761_v52 = vld [vmem:[%s6708_s0 + $0x19c] ss:$28 sps:$4 sm:$0xff]   ;;  %v6075_v54 = vmov 0  }
  0xc4   :  { %1864 = vmatpush1.bf16.msra.mxu0 %v5671_v55  ;;  %2316 = vmatpush1.bf16.msra.mxu1 %v5674_v56  ;;  %v5767_v55 = vld [vmem:[%s6708_s0 + $0x18] ss:$28 sps:$4 sm:$0xff]   ;;  %v5775_v56 = vld [vmem:[#allocation5] ss:$16 sps:$4 sm:$0xff]  }
  0xc5   :  { %1865 = vmatprep.subr.bf16.mxu0 %v5682_v57  ;;  %2317 = vmatprep.subr.bf16.mxu1 %v5685_v58  ;;  %v5778_v57 = vld [vmem:[#allocation5 + $0x8] ss:$16 sps:$4 sm:$0xff]   ;;  %v5783_v58 = vld [vmem:[#allocation5 + $0x24] ss:$16 sps:$4 sm:$0xff]  }
  0xc7   :  { %1809 = vmatmul.mubr.bf16.gmra.mrb[16].mxu0 %v5679_v59  ;;  %2261 = vmatmul.mubr.bf16.gmra.mrb[16].mxu1 %v5679_v59  ;;  %v5786_v59 = vld [vmem:[#allocation5 + $0x2c] ss:$16 sps:$4 sm:$0xff]  }
  0xc8   :  { %1866 = vmatpush1.bf16.msra.mxu0 %v5680_v60  ;;  %2318 = vmatpush1.bf16.msra.mxu1 %v5683_v61  ;;  %v5781_v60 = vld [vmem:[#allocation5 + $0x20] ss:$16 sps:$4 sm:$0xff]   ;;  %v5784_v61 = vld [vmem:[#allocation5 + $0x28] ss:$16 sps:$4 sm:$0xff]  }
  0xc9   :  { %1867 = vmatprep.subr.bf16.mxu0 %v5688_v62  ;;  %2319 = vmatprep.subr.bf16.mxu1 %v5691_v63  ;;  %v5789_v62 = vld [vmem:[#allocation5 + $0x44] ss:$16 sps:$4 sm:$0xff]   ;;  %v5792_v63 = vld [vmem:[#allocation5 + $0x4c] ss:$16 sps:$4 sm:$0xff]  }
  0xca   :  { %1818 = vmatprep.mubr.bf16.mxu0 %v5692_v1  ;;  %2270 = vmatprep.mubr.bf16.mxu1 %v5692_v1  ;;  %v5787_v1 = vld [vmem:[#allocation5 + $0x40] ss:$16 sps:$4 sm:$0xff]  }
  0xcc   :  { %1868 = vmatpush1.bf16.msra.mxu0 %v5686_v0  ;;  %2320 = vmatpush1.bf16.msra.mxu1 %v5689_v2  ;;  %v5768_v0 = vld [vmem:[%s6708_s0 + $0x50] ss:$28 sps:$4 sm:$0xff]   ;;  %v5790_v2 = vld [vmem:[#allocation5 + $0x48] ss:$16 sps:$4 sm:$0xff]  }
  0xcd   :  { %1869 = vmatprep.subr.bf16.mxu0 %v5697_v3  ;;  %2321 = vmatprep.subr.bf16.mxu1 %v5700_v5  ;;  %v5795_v3 = vld [vmem:[#allocation5 + $0x64] ss:$16 sps:$4 sm:$0xff]   ;;  %v5793_v5 = vld [vmem:[#allocation5 + $0x60] ss:$16 sps:$4 sm:$0xff]  }
  0xcf   :  { %1819 = vmatmul.mubr.bf16.gmra.mrb[20].mxu0 %v5694_v4  ;;  %2271 = vmatmul.mubr.bf16.gmra.mrb[20].mxu1 %v5694_v4  ;;  %v5798_v4 = vld [vmem:[#allocation5 + $0x6c] ss:$16 sps:$4 sm:$0xff]  }
  0xd0   :  { %1870 = vmatpush1.bf16.msra.mxu0 %v5695_v6  ;;  %2322 = vmatpush1.bf16.msra.mxu1 %v5698_v7  ;;  %v5796_v6 = vld [vmem:[#allocation5 + $0x68] ss:$16 sps:$4 sm:$0xff]   ;;  %v5801_v7 = vld [vmem:[#allocation5 + $0x84] ss:$16 sps:$4 sm:$0xff]  }
  0xd1   :  { %1871 = vmatprep.subr.bf16.mxu0 %v5703_v8  ;;  %2323 = vmatprep.subr.bf16.mxu1 %v5706_v9  ;;  %v5804_v8 = vld [vmem:[#allocation5 + $0x8c] ss:$16 sps:$4 sm:$0xff]   ;;  %v5769_v9 = vld [vmem:[%s6708_s0 + $0x88] ss:$28 sps:$4 sm:$0xff]  }
  0xd2   :  { %1828 = vmatprep.mubr.bf16.mxu0 %v5707_v10  ;;  %2280 = vmatprep.mubr.bf16.mxu1 %v5707_v10  ;;  %v5799_v10 = vld [vmem:[#allocation5 + $0x80] ss:$16 sps:$4 sm:$0xff]  }
  0xd4   :  { %1872 = vmatpush1.bf16.msra.mxu0 %v5701_v11  ;;  %2324 = vmatpush1.bf16.msra.mxu1 %v5704_v12  ;;  %v5802_v11 = vld [vmem:[#allocation5 + $0x88] ss:$16 sps:$4 sm:$0xff]   ;;  %v5807_v12 = vld [vmem:[#allocation5 + $0xa4] ss:$16 sps:$4 sm:$0xff]  }
  0xd5   :  { %1873 = vmatprep.subr.bf16.mxu0 %v5712_v13  ;;  %2325 = vmatprep.subr.bf16.mxu1 %v5715_v14  ;;  %v5810_v13 = vld [vmem:[#allocation5 + $0xac] ss:$16 sps:$4 sm:$0xff]   ;;  %v5805_v14 = vld [vmem:[#allocation5 + $0xa0] ss:$16 sps:$4 sm:$0xff]  }
  0xd7   :  { %1829 = vmatmul.mubr.bf16.gmra.mrb[24].mxu0 %v5709_v15  ;;  %2281 = vmatmul.mubr.bf16.gmra.mrb[24].mxu1 %v5709_v15  ;;  %v5808_v15 = vld [vmem:[#allocation5 + $0xa8] ss:$16 sps:$4 sm:$0xff]  }
  0xd8   :  { %1874 = vmatpush1.bf16.msra.mxu0 %v5710_v16  ;;  %2326 = vmatpush1.bf16.msra.mxu1 %v5713_v17  ;;  %v5813_v16 = vld [vmem:[#allocation5 + $0xc4] ss:$16 sps:$4 sm:$0xff]   ;;  %v5816_v17 = vld [vmem:[#allocation5 + $0xcc] ss:$16 sps:$4 sm:$0xff]  }
  0xd9   :  { %1875 = vmatprep.subr.bf16.mxu0 %v5718_v18  ;;  %2327 = vmatprep.subr.bf16.mxu1 %v5721_v19  ;;  %v5770_v18 = vld [vmem:[%s6708_s0 + $0xc0] ss:$28 sps:$4 sm:$0xff]  }
  0xda   :  { %1838 = vmatprep.mubr.bf16.mxu0 %v5722_v20  ;;  %2290 = vmatprep.mubr.bf16.mxu1 %v5722_v20  ;;  %v5811_v19 = vld [vmem:[#allocation5 + $0xc0] ss:$16 sps:$4 sm:$0xff]   ;;  %v5814_v20 = vld [vmem:[#allocation5 + $0xc8] ss:$16 sps:$4 sm:$0xff]  }
  0xdc   :  { %1876 = vmatpush1.bf16.msra.mxu0 %v5716_v21  ;;  %2328 = vmatpush1.bf16.msra.mxu1 %v5719_v22  ;;  %v5819_v21 = vld [vmem:[#allocation5 + $0xe4] ss:$16 sps:$4 sm:$0xff]   ;;  %v5822_v22 = vld [vmem:[#allocation5 + $0xec] ss:$16 sps:$4 sm:$0xff]  }
  0xdd   :  { %1877 = vmatprep.subr.bf16.mxu0 %v5727_v23  ;;  %2329 = vmatprep.subr.bf16.mxu1 %v5730_v24  ;;  %v5817_v23 = vld [vmem:[#allocation5 + $0xe0] ss:$16 sps:$4 sm:$0xff]   ;;  %v5820_v24 = vld [vmem:[#allocation5 + $0xe8] ss:$16 sps:$4 sm:$0xff]  }
  0xdf   :  { %1839 = vmatmul.mubr.bf16.gmra.mrb[28].mxu0 %v5724_v25  ;;  %2291 = vmatmul.mubr.bf16.gmra.mrb[28].mxu1 %v5724_v25  ;;  %v5825_v25 = vld [vmem:[#allocation5 + $0x104] ss:$16 sps:$4 sm:$0xff]  }
  0xe0   :  { %1878 = vmatpush1.bf16.msra.mxu0 %v5725_v26  ;;  %2330 = vmatpush1.bf16.msra.mxu1 %v5728_v27  ;;  %v5828_v26 = vld [vmem:[#allocation5 + $0x10c] ss:$16 sps:$4 sm:$0xff]   ;;  %v5771_v27 = vld [vmem:[%s6708_s0 + $0xf8] ss:$28 sps:$4 sm:$0xff]  }
  0xe1   :  { %1879 = vmatprep.subr.bf16.mxu0 %v5733_v28  ;;  %2331 = vmatprep.subr.bf16.mxu1 %v5736_v29  ;;  %v5823_v28 = vld [vmem:[#allocation5 + $0x100] ss:$16 sps:$4 sm:$0xff]   ;;  %v5826_v29 = vld [vmem:[#allocation5 + $0x108] ss:$16 sps:$4 sm:$0xff]  }
  0xe2   :  { %1881 = vmatprep.mubr.bf16.mxu0 %v5739_v30  ;;  %2333 = vmatprep.mubr.bf16.mxu1 %v5739_v30  ;;  %v5831_v30 = vld [vmem:[#allocation5 + $0x124] ss:$16 sps:$4 sm:$0xff]  }
  0xe4   :  { %1880 = vmatpush1.bf16.msra.mxu0 %v5731_v31  ;;  %2332 = vmatpush1.bf16.msra.mxu1 %v5734_v32  ;;  %v5834_v31 = vld [vmem:[#allocation5 + $0x12c] ss:$16 sps:$4 sm:$0xff]   ;;  %v5829_v32 = vld [vmem:[#allocation5 + $0x120] ss:$16 sps:$4 sm:$0xff]  }
  0xe5   :  { %1962 = vmatprep.subr.bf16.mxu0 %v5742_v33  ;;  %2414 = vmatprep.subr.bf16.mxu1 %v5766_v34  ;;  %v5832_v33 = vld [vmem:[#allocation5 + $0x128] ss:$16 sps:$4 sm:$0xff]   ;;  %v5837_v34 = vld [vmem:[#allocation5 + $0x144] ss:$16 sps:$4 sm:$0xff]  }
  0xe7   :  { %1882 = vmatmul.mubr.bf16.vlgmr.msra.gmra.mrb[0].mxu0 %v5737_v35  ;;  %2334 = vmatmul.mubr.bf16.vlgmr.msra.gmra.mrb[0].mxu1 %v5737_v35  ;;  %v5840_v35 = vld [vmem:[#allocation5 + $0x14c] ss:$16 sps:$4 sm:$0xff]  }
  0xe8   :  { %1963 = vmatpush1.bf16.msra.mxu0 %v5740_v36  ;;  %1891 = vmatprep.mubr.bf16.mxu0 %v5743_v37  ;;  %v5772_v36 = vld [vmem:[%s6708_s0 + $0x130] ss:$28 sps:$4 sm:$0xff]  }
  0xe9   :  { %2343 = vmatprep.mubr.bf16.mxu1 %v5743_v37  ;;  %2415 = vmatpush1.bf16.msra.mxu1 %v5764_v38  ;;  %v5835_v37 = vld [vmem:[#allocation5 + $0x140] ss:$16 sps:$4 sm:$0xff]   ;;  %v5838_v38 = vld [vmem:[#allocation5 + $0x148] ss:$16 sps:$4 sm:$0xff]  }
  0xea   :  { %3413 = vmatprep.subr.bf16.mxu0 %v5777_v39  ;;  %3639 = vmatprep.subr.bf16.mxu1 %v5780_v40  ;;  %v5843_v39 = vld [vmem:[#allocation5 + $0x164] ss:$16 sps:$4 sm:$0xff]   ;;  %v5846_v40 = vld [vmem:[#allocation5 + $0x16c] ss:$16 sps:$4 sm:$0xff]  }
  0xef   :  { %1892 = vmatmul.mubr.bf16.gmra.mrb[4].mxu0 %v5745_v41  ;;  %2344 = vmatmul.mubr.bf16.gmra.mrb[4].mxu1 %v5745_v41  ;;  %v5841_v41 = vld [vmem:[#allocation5 + $0x160] ss:$16 sps:$4 sm:$0xff]  }
  0xf0   :  { %1901 = vmatprep.mubr.bf16.mxu0 %v5746_v42  ;;  %2353 = vmatprep.mubr.bf16.mxu1 %v5746_v42  ;;  %v5844_v42 = vld [vmem:[#allocation5 + $0x168] ss:$16 sps:$4 sm:$0xff]  }
  0xf7   :  { %1902 = vmatmul.mubr.bf16.gmra.mrb[8].mxu0 %v5748_v43  ;;  %2354 = vmatmul.mubr.bf16.gmra.mrb[8].mxu1 %v5748_v43  ;;  %v5849_v43 = vld [vmem:[#allocation5 + $0x184] ss:$16 sps:$4 sm:$0xff]  }
  0xf8   :  { %1911 = vmatprep.mubr.bf16.mxu0 %v5749_v44  ;;  %2363 = vmatprep.mubr.bf16.mxu1 %v5749_v44  ;;  %v5852_v44 = vld [vmem:[#allocation5 + $0x18c] ss:$16 sps:$4 sm:$0xff]  }
  0xff   :  { %1912 = vmatmul.mubr.bf16.gmra.mrb[12].mxu0 %v5751_v45  ;;  %2364 = vmatmul.mubr.bf16.gmra.mrb[12].mxu1 %v5751_v45  ;;  %v5773_v45 = vld [vmem:[%s6708_s0 + $0x168] ss:$28 sps:$4 sm:$0xff]  }
 0x100   :  { %1921 = vmatprep.mubr.bf16.mxu0 %v5752_v46  ;;  %2373 = vmatprep.mubr.bf16.mxu1 %v5752_v46  ;;  %v5847_v46 = vld [vmem:[#allocation5 + $0x180] ss:$16 sps:$4 sm:$0xff]  }
 0x107   :  { %1922 = vmatmul.mubr.bf16.gmra.mrb[16].mxu0 %v5754_v47  ;;  %2374 = vmatmul.mubr.bf16.gmra.mrb[16].mxu1 %v5754_v47  ;;  %v5850_v47 = vld [vmem:[#allocation5 + $0x188] ss:$16 sps:$4 sm:$0xff]  }
 0x108   :  { %1931 = vmatprep.mubr.bf16.mxu0 %v5755_v48  ;;  %2383 = vmatprep.mubr.bf16.mxu1 %v5755_v48  ;;  %v5855_v48 = vld [vmem:[#allocation5 + $0x1a4] ss:$16 sps:$4 sm:$0xff]  }
 0x10f   :  { %1932 = vmatmul.mubr.bf16.gmra.mrb[20].mxu0 %v5757_v49  ;;  %2384 = vmatmul.mubr.bf16.gmra.mrb[20].mxu1 %v5757_v49  ;;  %v5858_v49 = vld [vmem:[#allocation5 + $0x1ac] ss:$16 sps:$4 sm:$0xff]  }
 0x110   :  { %1941 = vmatprep.mubr.bf16.mxu0 %v5758_v50  ;;  %2393 = vmatprep.mubr.bf16.mxu1 %v5758_v50  ;;  %v5853_v50 = vld [vmem:[#allocation5 + $0x1a0] ss:$16 sps:$4 sm:$0xff]  }
 0x117   :  { %1942 = vmatmul.mubr.bf16.gmra.mrb[24].mxu0 %v5760_v51  ;;  %2394 = vmatmul.mubr.bf16.gmra.mrb[24].mxu1 %v5760_v51  ;;  %v5856_v51 = vld [vmem:[#allocation5 + $0x1a8] ss:$16 sps:$4 sm:$0xff]  }
 0x118   :  { %1951 = vmatprep.mubr.bf16.mxu0 %v5761_v52  ;;  %2403 = vmatprep.mubr.bf16.mxu1 %v5761_v52  ;;  %v5774_v52 = vld [vmem:[%s6708_s0 + $0x1a0] ss:$28 sps:$4 sm:$0xff]  }
 0x11f   :  { %1952 = vmatmul.mubr.bf16.gmra.mrb[28].mxu0 %v5763_v53  ;;  %2404 = vmatmul.mubr.bf16.gmra.mrb[28].mxu1 %v5763_v53  ;;  %v5861_v53 = vld [vmem:[#allocation5 + $0x1c4] ss:$16 sps:$4 sm:$0xff]  }
 0x120   :  { %1994 = vmatprep.mubr.bf16.mxu0 %v6075_v54  ;;  %2446 = vmatprep.mubr.bf16.mxu1 %v6075_v54 }
 0x127   :  { %4704 = vmatmul.mubr.msk.bf16.vlgmr.msra.gmra.mrb[0].mxu0 %vm1598_vm0, %v5767_v55  ;;  %4712 = vmatmul.mubr.msk.bf16.vlgmr.msra.gmra.mrb[0].mxu1 %vm1598_vm0, %v5767_v55  ;;  %v5864_v55 = vld [vmem:[#allocation5 + $0x1cc] ss:$16 sps:$4 sm:$0xff]  }
 0x128   :  { %2004 = vmatprep.mubr.bf16.mxu0 %v6075_v54  ;;  %2456 = vmatprep.mubr.bf16.mxu1 %v6075_v54 }
 0x129   :  { %3414 = vmatpush1.bf16.msra.mxu0 %v5775_v56  ;;  %3640 = vmatpush1.bf16.msra.mxu1 %v5778_v57  ;;  %v5859_v56 = vld [vmem:[#allocation5 + $0x1c0] ss:$16 sps:$4 sm:$0xff]   ;;  %v5867_v57 = vld [vmem:[#allocation5 + $0x1e4] ss:$16 sps:$4 sm:$0xff]  }
 0x12a   :  { %3415 = vmatprep.subr.bf16.mxu0 %v5783_v58  ;;  %3641 = vmatprep.subr.bf16.mxu1 %v5786_v59  ;;  %v5870_v58 = vld [vmem:[#allocation5 + $0x1ec] ss:$16 sps:$4 sm:$0xff]   ;;  %v5865_v59 = vld [vmem:[#allocation5 + $0x1e0] ss:$16 sps:$4 sm:$0xff]  }
 0x12d   :  { %3416 = vmatpush1.bf16.msra.mxu0 %v5781_v60  ;;  %3642 = vmatpush1.bf16.msra.mxu1 %v5784_v61  ;;  %v5868_v60 = vld [vmem:[#allocation5 + $0x1e8] ss:$16 sps:$4 sm:$0xff]   ;;  %v5873_v61 = vld [vmem:[#allocation5 + $0x204] ss:$16 sps:$4 sm:$0xff]  }
 0x12e   :  { %3417 = vmatprep.subr.bf16.mxu0 %v5789_v62  ;;  %3643 = vmatprep.subr.bf16.mxu1 %v5792_v63  ;;  %v5876_v62 = vld [vmem:[#allocation5 + $0x20c] ss:$16 sps:$4 sm:$0xff]   ;;  %v318_v63 = vlaneseq }
 0x12f   :  { %4705 = vmatmul.mubr.msk.bf16.gmra.mrb[4].mxu0 %vm1598_vm0, %v5768_v0  ;;  %4713 = vmatmul.mubr.msk.bf16.gmra.mrb[4].mxu1 %vm1598_vm0, %v5768_v0 }
 0x130   :  { %2014 = vmatprep.mubr.bf16.mxu0 %v6075_v54  ;;  %2466 = vmatprep.mubr.bf16.mxu1 %v6075_v54  ;;  %v6343_v0 = vshrl.u32 %v318_v63, 7 }
 0x131   :  { %3418 = vmatpush1.bf16.msra.mxu0 %v5787_v1  ;;  %3644 = vmatpush1.bf16.msra.mxu1 %v5790_v2 }
 0x132   :  { %3419 = vmatprep.subr.bf16.mxu0 %v5795_v3  ;;  %3645 = vmatprep.subr.bf16.mxu1 %v5798_v4  ;;  %v320_v1 = vsub.s32 0, %v6343_v0  ;;  %v328_v2 = vsub.s32 2, %v6343_v0  ;;  %v316_v3 = vld [vmem:[%s6710_s2] sm:$0xf]  ;;  %v324_v4 = vsub.s32 1, %v6343_v0 }
 0x135   :  { %3420 = vmatpush1.bf16.msra.mxu0 %v5793_v5  ;;  %3646 = vmatpush1.bf16.msra.mxu1 %v5796_v6  ;;  %v332_v5 = vsub.s32 3, %v6343_v0  ;;  %v6354_v6 = vrot.slane %v316_v3, %v320_v1 }
 0x136   :  { %3421 = vmatprep.subr.bf16.mxu0 %v5801_v7  ;;  %3647 = vmatprep.subr.bf16.mxu1 %v5804_v8  ;;  %v6358_v7 = vrot.slane %v316_v3, %v328_v2  ;;  %v6362_v8 = vrot.slane %v316_v3, %v324_v4 }
 0x137   :  { %4706 = vmatmul.mubr.msk.bf16.gmra.mrb[8].mxu0 %vm1598_vm0, %v5769_v9  ;;  %4714 = vmatmul.mubr.msk.bf16.gmra.mrb[8].mxu1 %vm1598_vm0, %v5769_v9  ;;  %v6366_v9 = vrot.slane %v316_v3, %v332_v5 }
 0x138   :  { %2024 = vmatprep.mubr.bf16.mxu0 %v6075_v54  ;;  %2476 = vmatprep.mubr.bf16.mxu1 %v6075_v54 }
 0x139   :  { %3422 = vmatpush1.bf16.msra.mxu0 %v5799_v10  ;;  %3648 = vmatpush1.bf16.msra.mxu1 %v5802_v11 }
 0x13a   :  { %3423 = vmatprep.subr.bf16.mxu0 %v5807_v12  ;;  %3649 = vmatprep.subr.bf16.mxu1 %v5810_v13 }
 0x13d   :  { %3424 = vmatpush1.bf16.msra.mxu0 %v5805_v14  ;;  %3650 = vmatpush1.bf16.msra.mxu1 %v5808_v15 }
 0x13e   :  { %3425 = vmatprep.subr.bf16.mxu0 %v5813_v16  ;;  %3651 = vmatprep.subr.bf16.mxu1 %v5816_v17 }
 0x13f   :  { %4707 = vmatmul.mubr.msk.bf16.gmra.mrb[12].mxu0 %vm1598_vm0, %v5770_v18  ;;  %4715 = vmatmul.mubr.msk.bf16.gmra.mrb[12].mxu1 %vm1598_vm0, %v5770_v18 }
 0x140   :  { %2034 = vmatprep.mubr.bf16.mxu0 %v6075_v54  ;;  %2486 = vmatprep.mubr.bf16.mxu1 %v6075_v54 }
 0x141   :  { %3426 = vmatpush1.bf16.msra.mxu0 %v5811_v19  ;;  %3652 = vmatpush1.bf16.msra.mxu1 %v5814_v20 }
 0x142   :  { %3427 = vmatprep.subr.bf16.mxu0 %v5819_v21  ;;  %3653 = vmatprep.subr.bf16.mxu1 %v5822_v22 }
 0x145   :  { %3428 = vmatpush1.bf16.msra.mxu0 %v5817_v23  ;;  %3654 = vmatpush1.bf16.msra.mxu1 %v5820_v24 }
 0x146   :  { %3429 = vmatprep.subr.bf16.mxu0 %v5825_v25  ;;  %3655 = vmatprep.subr.bf16.mxu1 %v5828_v26 }
 0x147   :  { %4708 = vmatmul.mubr.msk.bf16.gmra.mrb[16].mxu0 %vm1598_vm0, %v5771_v27  ;;  %4716 = vmatmul.mubr.msk.bf16.gmra.mrb[16].mxu1 %vm1598_vm0, %v5771_v27 }
 0x148   :  { %2044 = vmatprep.mubr.bf16.mxu0 %v6075_v54  ;;  %2496 = vmatprep.mubr.bf16.mxu1 %v6075_v54 }
 0x149   :  { %3430 = vmatpush1.bf16.msra.mxu0 %v5823_v28  ;;  %3656 = vmatpush1.bf16.msra.mxu1 %v5826_v29 }
 0x14a   :  { %3431 = vmatprep.subr.bf16.mxu0 %v5831_v30  ;;  %3657 = vmatprep.subr.bf16.mxu1 %v5834_v31 }
 0x14d   :  { %3432 = vmatpush1.bf16.msra.mxu0 %v5829_v32  ;;  %3658 = vmatpush1.bf16.msra.mxu1 %v5832_v33 }
 0x14e   :  { %3433 = vmatprep.subr.bf16.mxu0 %v5837_v34  ;;  %3659 = vmatprep.subr.bf16.mxu1 %v5840_v35 }
 0x14f   :  { %4709 = vmatmul.mubr.msk.bf16.gmra.mrb[20].mxu0 %vm1598_vm0, %v5772_v36  ;;  %4717 = vmatmul.mubr.msk.bf16.gmra.mrb[20].mxu1 %vm1598_vm0, %v5772_v36 }
 0x150   :  { %2054 = vmatprep.mubr.bf16.mxu0 %v6075_v54  ;;  %2506 = vmatprep.mubr.bf16.mxu1 %v6075_v54 }
 0x151   :  { %3434 = vmatpush1.bf16.msra.mxu0 %v5835_v37  ;;  %3660 = vmatpush1.bf16.msra.mxu1 %v5838_v38 }
 0x152   :  { %3435 = vmatprep.subr.bf16.mxu0 %v5843_v39  ;;  %3661 = vmatprep.subr.bf16.mxu1 %v5846_v40  ;;  %v5871_v40 = vld [vmem:[#allocation5 + $0x200] ss:$16 sps:$4 sm:$0xff]  }
 0x155   :  { %3436 = vmatpush1.bf16.msra.mxu0 %v5841_v41  ;;  %3662 = vmatpush1.bf16.msra.mxu1 %v5844_v42  ;;  %v5874_v41 = vld [vmem:[#allocation5 + $0x208] ss:$16 sps:$4 sm:$0xff]  }
 0x156   :  { %3437 = vmatprep.subr.bf16.mxu0 %v5849_v43  ;;  %3663 = vmatprep.subr.bf16.mxu1 %v5852_v44 }
 0x157   :  { %4710 = vmatmul.mubr.msk.bf16.gmra.mrb[24].mxu0 %vm1598_vm0, %v5773_v45  ;;  %4718 = vmatmul.mubr.msk.bf16.gmra.mrb[24].mxu1 %vm1598_vm0, %v5773_v45 }
 0x158   :  { %2064 = vmatprep.mubr.bf16.mxu0 %v6075_v54  ;;  %2516 = vmatprep.mubr.bf16.mxu1 %v6075_v54  ;;  %v5862_v54 = vld [vmem:[#allocation5 + $0x1c8] ss:$16 sps:$4 sm:$0xff]  }
 0x159   :  { %3438 = vmatpush1.bf16.msra.mxu0 %v5847_v46  ;;  %3664 = vmatpush1.bf16.msra.mxu1 %v5850_v47  ;;  %v5879_v46 = vld [vmem:[#allocation5 + $0x224] ss:$16 sps:$4 sm:$0xff]   ;;  %v5882_v47 = vld [vmem:[#allocation5 + $0x22c] ss:$16 sps:$4 sm:$0xff]  }
 0x15a   :  { %3439 = vmatprep.subr.bf16.mxu0 %v5855_v48  ;;  %3665 = vmatprep.subr.bf16.mxu1 %v5858_v49 }
 0x15d   :  { %3440 = vmatpush1.bf16.msra.mxu0 %v5853_v50  ;;  %3666 = vmatpush1.bf16.msra.mxu1 %v5856_v51 }
 0x15e   :  { %3441 = vmatprep.subr.bf16.mxu0 %v5861_v53  ;;  %3667 = vmatprep.subr.bf16.mxu1 %v5864_v55 }
 0x15f   :  { %4711 = vmatmul.mubr.msk.bf16.gmra.mrb[28].mxu0 %vm1598_vm0, %v5774_v52  ;;  %4719 = vmatmul.mubr.msk.bf16.gmra.mrb[28].mxu1 %vm1598_vm0, %v5774_v52 }
 0x161   :  { %3442 = vmatpush1.bf16.msra.mxu0 %v5859_v56  ;;  %3668 = vmatpush1.bf16.msra.mxu1 %v5862_v54 }
 0x162   :  { %3443 = vmatprep.subr.bf16.mxu0 %v5867_v57  ;;  %3669 = vmatprep.subr.bf16.mxu1 %v5870_v58  ;;  %v5877_v58 = vld [vmem:[#allocation5 + $0x220] ss:$16 sps:$4 sm:$0xff]  }
 0x165   :  { %3444 = vmatpush1.bf16.msra.mxu0 %v5865_v59  ;;  %3670 = vmatpush1.bf16.msra.mxu1 %v5868_v60  ;;  %v5880_v59 = vld [vmem:[#allocation5 + $0x228] ss:$16 sps:$4 sm:$0xff]   ;;  %v5885_v60 = vld [vmem:[#allocation5 + $0x244] ss:$16 sps:$4 sm:$0xff]  }
 0x166   :  { %3526 = vmatprep.subr.bf16.mxu0 %v5873_v61  ;;  %3752 = vmatprep.subr.bf16.mxu1 %v5876_v62 }
 0x1fa   :  { %v1996_v10 = vpop.f32.mrb[0].mxu0  ;;  %v2448_v11 = vpop.f32.mrb[0].mxu1 }
 0x1fb   :  { %v5009_v12 = vadd.f32 %v1996_v10, %v6354_v6  ;;  %v5041_v13 = vadd.f32 %v2448_v11, %v6358_v7  ;;  %v1998_v14 = vpop.f32.mrb[1].mxu0  ;;  %v2450_v15 = vpop.f32.mrb[1].mxu1  ;;  %v5888_v10 = vld [vmem:[#allocation5 + $0x24c] ss:$16 sps:$4 sm:$0xff]  }
 0x1fc   :  { %v5010_v16 = vadd.f32 %v1998_v14, %v6362_v8  ;;  %v5042_v17 = vadd.f32 %v2450_v15, %v6366_v9  ;;  %v2000_v18 = vpop.f32.mrb[2].mxu0  ;;  %v2452_v19 = vpop.f32.mrb[2].mxu1 }
 0x1fd   :  { %v5011_v20 = vadd.f32 %v2000_v18, %v6354_v6  ;;  %v5043_v21 = vadd.f32 %v2452_v19, %v6358_v7  ;;  %v2002_v22 = vpop.f32.mrb[3].mxu0  ;;  %v2454_v23 = vpop.f32.mrb[3].mxu1  ;;  %v2527_v26 = vmax.f32 %v5009_v12, 0.0  ;;  %v2529_v27 = vmax.f32 %v5041_v13, 0.0 }
 0x1fe   :  { %v5012_v24 = vadd.f32 %v2002_v22, %v6362_v8  ;;  %v5044_v25 = vadd.f32 %v2454_v23, %v6366_v9  ;;  %v2528_v30 = vmax.f32 %v5010_v16, 0.0  ;;  %v2530_v31 = vmax.f32 %v5042_v17, 0.0  ;;  %v5886_v22 = vld [vmem:[#allocation5 + $0x248] ss:$16 sps:$4 sm:$0xff]  }
 0x1ff   :  { %v2531_v28 = vmax.f32 %v5011_v20, 0.0  ;;  %v2533_v29 = vmax.f32 %v5043_v21, 0.0  ;;  %v5883_v21 = vld [vmem:[#allocation5 + $0x240] ss:$16 sps:$4 sm:$0xff]  }
 0x200   :  { %v2532_v32 = vmax.f32 %v5012_v24, 0.0  ;;  %v2534_v33 = vmax.f32 %v5044_v25, 0.0 }
 0x201   :  { %v2591_v34 = vpack.c.bf16 %v2531_v28, %v2527_v26  ;;  %v6376_v35 = vpack.c.bf16 %v2533_v29, %v2529_v27  ;;  %v5891_v27 = vld [vmem:[#allocation5 + $0x264] ss:$16 sps:$4 sm:$0xff]   ;;  %v5894_v28 = vld [vmem:[#allocation5 + $0x26c] ss:$16 sps:$4 sm:$0xff]  }
 0x202   :  { %v2592_v36 = vpack.c.bf16 %v2532_v32, %v2528_v30  ;;  %v6378_v37 = vpack.c.bf16 %v2534_v33, %v2530_v31  ;;  %v2006_v38 = vpop.f32.mrb[4].mxu0  ;;  %v2458_v39 = vpop.f32.mrb[4].mxu1 }
 0x203   :  { %v5013_v42 = vadd.f32 %v2006_v38, %v6354_v6  ;;  %v5045_v43 = vadd.f32 %v2458_v39, %v6358_v7  ;;  %v2008_v44 = vpop.f32.mrb[5].mxu0  ;;  %v2460_v45 = vpop.f32.mrb[5].mxu1 }
 0x204   :  { %v5014_v48 = vadd.f32 %v2008_v44, %v6362_v8  ;;  %v5046_v49 = vadd.f32 %v2460_v45, %v6366_v9  ;;  %v2010_v50 = vpop.f32.mrb[6].mxu0  ;;  %v2462_v51 = vpop.f32.mrb[6].mxu1  ;;  %3445 = vmatprep.mubr.bf16.mxu0 %v2592_v36  ;;  %3671 = vmatprep.mubr.bf16.mxu1 %v2592_v36 }
 0x205   :  { %v5015_v52 = vadd.f32 %v2010_v50, %v6354_v6  ;;  %v5047_v53 = vadd.f32 %v2462_v51, %v6358_v7  ;;  %v2012_v55 = vpop.f32.mrb[7].mxu0  ;;  %v2464_v56 = vpop.f32.mrb[7].mxu1  ;;  %3446 = vmatmul.mubr.bf16.vlgmr.msra.gmra.mrb[32].mxu0 %v2591_v34  ;;  %3672 = vmatmul.mubr.bf16.vlgmr.msra.gmra.mrb[32].mxu1 %v2591_v34  ;;  %v2535_v61 = vmax.f32 %v5013_v42, 0.0  ;;  %v2537_v62 = vmax.f32 %v5045_v43, 0.0  ;;  %v5892_v42 = vld [vmem:[#allocation5 + $0x268] ss:$16 sps:$4 sm:$0xff]  }
 0x206   :  { %v5016_v54 = vadd.f32 %v2012_v55, %v6362_v8  ;;  %v5048_v57 = vadd.f32 %v2464_v56, %v6366_v9  ;;  %3527 = vmatpush1.bf16.msra.mxu0 %v5871_v40  ;;  %3753 = vmatpush1.bf16.msra.mxu1 %v5874_v41  ;;  %v2536_v11 = vmax.f32 %v5014_v48, 0.0  ;;  %v2538_v12 = vmax.f32 %v5046_v49, 0.0  ;;  %v5889_v41 = vld [vmem:[#allocation5 + $0x260] ss:$16 sps:$4 sm:$0xff]   ;;  %v5897_v43 = vld [vmem:[#allocation5 + $0x284] ss:$16 sps:$4 sm:$0xff]  }
 0x207   :  { %v2539_v63 = vmax.f32 %v5015_v52, 0.0  ;;  %v2541_v3 = vmax.f32 %v5047_v53, 0.0  ;;  %3528 = vmatprep.subr.bf16.mxu0 %v5879_v46  ;;  %3754 = vmatprep.subr.bf16.mxu1 %v5882_v47  ;;  %v5900_v48 = vld [vmem:[#allocation5 + $0x28c] ss:$16 sps:$4 sm:$0xff]  }
 0x208   :  { %v2540_v13 = vmax.f32 %v5016_v54, 0.0  ;;  %v2542_v14 = vmax.f32 %v5048_v57, 0.0 }
 0x209   :  { %v2595_v15 = vpack.c.bf16 %v2539_v63, %v2535_v61  ;;  %v6388_v16 = vpack.c.bf16 %v2541_v3, %v2537_v62 }
 0x20a   :  { %v2596_v17 = vpack.c.bf16 %v2540_v13, %v2536_v11  ;;  %v6390_v18 = vpack.c.bf16 %v2542_v14, %v2538_v12  ;;  %v2016_v19 = vpop.f32.mrb[8].mxu0  ;;  %v2468_v20 = vpop.f32.mrb[8].mxu1  ;;  %3529 = vmatpush1.bf16.msra.mxu0 %v5877_v58  ;;  %3755 = vmatpush1.bf16.msra.mxu1 %v5880_v59  ;;  %v5895_v59 = vld [vmem:[#allocation5 + $0x280] ss:$16 sps:$4 sm:$0xff]   ;;  %v5906_v11 = vld [vmem:[#allocation5 + $0x2ac] ss:$16 sps:$4 sm:$0xff]  }
 0x20b   :  { %v5017_v23 = vadd.f32 %v2016_v19, %v6354_v6  ;;  %v5049_v24 = vadd.f32 %v2468_v20, %v6358_v7  ;;  %v2018_v25 = vpop.f32.mrb[9].mxu0  ;;  %v2470_v26 = vpop.f32.mrb[9].mxu1  ;;  %3530 = vmatprep.subr.bf16.mxu0 %v5885_v60  ;;  %3756 = vmatprep.subr.bf16.mxu1 %v5888_v10  ;;  %v5898_v60 = vld [vmem:[#allocation5 + $0x288] ss:$16 sps:$4 sm:$0xff]   ;;  %v5903_v10 = vld [vmem:[#allocation5 + $0x2a4] ss:$16 sps:$4 sm:$0xff]  }
 0x20c   :  { %v5018_v29 = vadd.f32 %v2018_v25, %v6362_v8  ;;  %v5050_v30 = vadd.f32 %v2470_v26, %v6366_v9  ;;  %v2020_v31 = vpop.f32.mrb[10].mxu0  ;;  %v2472_v32 = vpop.f32.mrb[10].mxu1  ;;  %3455 = vmatprep.mubr.bf16.mxu0 %v2596_v17  ;;  %3681 = vmatprep.mubr.bf16.mxu1 %v2596_v17  ;;  %v5904_v25 = vld [vmem:[#allocation5 + $0x2a8] ss:$16 sps:$4 sm:$0xff]   ;;  %v5909_v26 = vld [vmem:[#allocation5 + $0x2c4] ss:$16 sps:$4 sm:$0xff]  }
 0x20d   :  { %v5019_v33 = vadd.f32 %v2020_v31, %v6354_v6  ;;  %v5051_v34 = vadd.f32 %v2472_v32, %v6358_v7  ;;  %v2022_v36 = vpop.f32.mrb[11].mxu0  ;;  %v2474_v38 = vpop.f32.mrb[11].mxu1  ;;  %3456 = vmatmul.mubr.bf16.gmra.mrb[36].mxu0 %v2595_v15  ;;  %3682 = vmatmul.mubr.bf16.gmra.mrb[36].mxu1 %v2595_v15  ;;  %v2543_v44 = vmax.f32 %v5017_v23, 0.0  ;;  %v2545_v45 = vmax.f32 %v5049_v24, 0.0  ;;  %v5901_v24 = vld [vmem:[#allocation5 + $0x2a0] ss:$16 sps:$4 sm:$0xff]  }
 0x20e   :  { %v5020_v39 = vadd.f32 %v2022_v36, %v6362_v8  ;;  %v5052_v40 = vadd.f32 %v2474_v38, %v6366_v9  ;;  %3531 = vmatpush1.bf16.msra.mxu0 %v5883_v21  ;;  %3757 = vmatpush1.bf16.msra.mxu1 %v5886_v22  ;;  %v2544_v49 = vmax.f32 %v5018_v29, 0.0  ;;  %v2546_v50 = vmax.f32 %v5050_v30, 0.0  ;;  %v5912_v31 = vld [vmem:[#allocation5 + $0x2cc] ss:$16 sps:$4 sm:$0xff]  }
 0x20f   :  { %v2547_v46 = vmax.f32 %v5019_v33, 0.0  ;;  %v2549_v47 = vmax.f32 %v5051_v34, 0.0  ;;  %3532 = vmatprep.subr.bf16.mxu0 %v5891_v27  ;;  %3758 = vmatprep.subr.bf16.mxu1 %v5894_v28 }
 0x210   :  { %v2548_v51 = vmax.f32 %v5020_v39, 0.0  ;;  %v2550_v52 = vmax.f32 %v5052_v40, 0.0 }
 0x211   :  { %v2599_v53 = vpack.c.bf16 %v2547_v46, %v2543_v44  ;;  %v6400_v55 = vpack.c.bf16 %v2549_v47, %v2545_v45  ;;  %v5907_v44 = vld [vmem:[#allocation5 + $0x2c0] ss:$16 sps:$4 sm:$0xff]   ;;  %v5910_v45 = vld [vmem:[#allocation5 + $0x2c8] ss:$16 sps:$4 sm:$0xff]  }
 0x212   :  { %v2600_v56 = vpack.c.bf16 %v2548_v51, %v2544_v49  ;;  %v6402_v54 = vpack.c.bf16 %v2550_v52, %v2546_v50  ;;  %v2026_v57 = vpop.f32.mrb[12].mxu0  ;;  %v2478_v58 = vpop.f32.mrb[12].mxu1  ;;  %3533 = vmatpush1.bf16.msra.mxu0 %v5889_v41  ;;  %3759 = vmatpush1.bf16.msra.mxu1 %v5892_v42  ;;  %v5915_v50 = vld [vmem:[#allocation5 + $0x2e4] ss:$16 sps:$4 sm:$0xff]   ;;  %v5918_v51 = vld [vmem:[#allocation5 + $0x2ec] ss:$16 sps:$4 sm:$0xff]  }
 0x213   :  { %v5021_v61 = vadd.f32 %v2026_v57, %v6354_v6  ;;  %v5053_v62 = vadd.f32 %v2478_v58, %v6358_v7  ;;  %v2028_v63 = vpop.f32.mrb[13].mxu0  ;;  %v2480_v3 = vpop.f32.mrb[13].mxu1  ;;  %3534 = vmatprep.subr.bf16.mxu0 %v5897_v43  ;;  %3760 = vmatprep.subr.bf16.mxu1 %v5900_v48 }
 0x214   :  { %v5022_v12 = vadd.f32 %v2028_v63, %v6362_v8  ;;  %v5054_v13 = vadd.f32 %v2480_v3, %v6366_v9  ;;  %v2030_v14 = vpop.f32.mrb[14].mxu0  ;;  %v2482_v15 = vpop.f32.mrb[14].mxu1  ;;  %3465 = vmatprep.mubr.bf16.mxu0 %v2600_v56  ;;  %3691 = vmatprep.mubr.bf16.mxu1 %v2600_v56  ;;  %v5913_v3 = vld [vmem:[#allocation5 + $0x2e0] ss:$16 sps:$4 sm:$0xff]  }
 0x215   :  { %v5023_v17 = vadd.f32 %v2030_v14, %v6354_v6  ;;  %v5055_v19 = vadd.f32 %v2482_v15, %v6358_v7  ;;  %v2032_v20 = vpop.f32.mrb[15].mxu0  ;;  %v2484_v21 = vpop.f32.mrb[15].mxu1  ;;  %3466 = vmatmul.mubr.bf16.gmra.mrb[40].mxu0 %v2599_v53  ;;  %3692 = vmatmul.mubr.bf16.gmra.mrb[40].mxu1 %v2599_v53  ;;  %v2551_v27 = vmax.f32 %v5021_v61, 0.0  ;;  %v2553_v28 = vmax.f32 %v5053_v62, 0.0 }
 0x216   :  { %v5024_v22 = vadd.f32 %v2032_v20, %v6362_v8  ;;  %v5056_v23 = vadd.f32 %v2484_v21, %v6366_v9  ;;  %3535 = vmatpush1.bf16.msra.mxu0 %v5895_v59  ;;  %3761 = vmatpush1.bf16.msra.mxu1 %v5898_v60  ;;  %v2552_v32 = vmax.f32 %v5022_v12, 0.0  ;;  %v2554_v33 = vmax.f32 %v5054_v13, 0.0 }
 0x217   :  { %v2555_v29 = vmax.f32 %v5023_v17, 0.0  ;;  %v2557_v30 = vmax.f32 %v5055_v19, 0.0  ;;  %3536 = vmatprep.subr.bf16.mxu0 %v5903_v10  ;;  %3762 = vmatprep.subr.bf16.mxu1 %v5906_v11  ;;  %v5916_v10 = vld [vmem:[#allocation5 + $0x2e8] ss:$16 sps:$4 sm:$0xff]   ;;  %v5921_v11 = vld [vmem:[#allocation5 + $0x304] ss:$16 sps:$4 sm:$0xff]  }
 0x218   :  { %v2556_v34 = vmax.f32 %v5024_v22, 0.0  ;;  %v2558_v36 = vmax.f32 %v5056_v23, 0.0  ;;  %v5924_v17 = vld [vmem:[#allocation5 + $0x30c] ss:$16 sps:$4 sm:$0xff]  }
 0x219   :  { %v2603_v38 = vpack.c.bf16 %v2555_v29, %v2551_v27  ;;  %v6412_v39 = vpack.c.bf16 %v2557_v30, %v2553_v28  ;;  %v5919_v29 = vld [vmem:[#allocation5 + $0x300] ss:$16 sps:$4 sm:$0xff]   ;;  %v5922_v30 = vld [vmem:[#allocation5 + $0x308] ss:$16 sps:$4 sm:$0xff]  }
 0x21a   :  { %v2604_v40 = vpack.c.bf16 %v2556_v34, %v2552_v32  ;;  %v6414_v41 = vpack.c.bf16 %v2558_v36, %v2554_v33  ;;  %v2036_v42 = vpop.f32.mrb[16].mxu0  ;;  %v2488_v43 = vpop.f32.mrb[16].mxu1  ;;  %3537 = vmatpush1.bf16.msra.mxu0 %v5901_v24  ;;  %3763 = vmatpush1.bf16.msra.mxu1 %v5904_v25  ;;  %v5927_v36 = vld [vmem:[#allocation5 + $0x324] ss:$16 sps:$4 sm:$0xff]  }
 0x21b   :  { %v5025_v46 = vadd.f32 %v2036_v42, %v6354_v6  ;;  %v5057_v47 = vadd.f32 %v2488_v43, %v6358_v7  ;;  %v2038_v48 = vpop.f32.mrb[17].mxu0  ;;  %v2490_v49 = vpop.f32.mrb[17].mxu1  ;;  %3538 = vmatprep.subr.bf16.mxu0 %v5909_v26  ;;  %3764 = vmatprep.subr.bf16.mxu1 %v5912_v31 }
 0x21c   :  { %v5026_v52 = vadd.f32 %v2038_v48, %v6362_v8  ;;  %v5058_v53 = vadd.f32 %v2490_v49, %v6366_v9  ;;  %v2040_v56 = vpop.f32.mrb[18].mxu0  ;;  %v2492_v57 = vpop.f32.mrb[18].mxu1  ;;  %3475 = vmatprep.mubr.bf16.mxu0 %v2604_v40  ;;  %3701 = vmatprep.mubr.bf16.mxu1 %v2604_v40 }
 0x21d   :  { %v5027_v58 = vadd.f32 %v2040_v56, %v6354_v6  ;;  %v5059_v59 = vadd.f32 %v2492_v57, %v6358_v7  ;;  %v2042_v60 = vpop.f32.mrb[19].mxu0  ;;  %v2494_v61 = vpop.f32.mrb[19].mxu1  ;;  %3476 = vmatmul.mubr.bf16.gmra.mrb[44].mxu0 %v2603_v38  ;;  %3702 = vmatmul.mubr.bf16.gmra.mrb[44].mxu1 %v2603_v38  ;;  %v2559_v12 = vmax.f32 %v5025_v46, 0.0  ;;  %v2561_v13 = vmax.f32 %v5057_v47, 0.0  ;;  %v5930_v38 = vld [vmem:[#allocation5 + $0x32c] ss:$16 sps:$4 sm:$0xff]  }
 0x21e   :  { %v5028_v62 = vadd.f32 %v2042_v60, %v6362_v8  ;;  %v5060_v63 = vadd.f32 %v2494_v61, %v6366_v9  ;;  %3539 = vmatpush1.bf16.msra.mxu0 %v5907_v44  ;;  %3765 = vmatpush1.bf16.msra.mxu1 %v5910_v45  ;;  %v2560_v19 = vmax.f32 %v5026_v52, 0.0  ;;  %v2562_v20 = vmax.f32 %v5058_v53, 0.0  ;;  %v5928_v52 = vld [vmem:[#allocation5 + $0x328] ss:$16 sps:$4 sm:$0xff]   ;;  %v5933_v53 = vld [vmem:[#allocation5 + $0x344] ss:$16 sps:$4 sm:$0xff]  }
 0x21f   :  { %v2563_v14 = vmax.f32 %v5027_v58, 0.0  ;;  %v2565_v15 = vmax.f32 %v5059_v59, 0.0  ;;  %3540 = vmatprep.subr.bf16.mxu0 %v5915_v50  ;;  %3766 = vmatprep.subr.bf16.mxu1 %v5918_v51  ;;  %v5925_v51 = vld [vmem:[#allocation5 + $0x320] ss:$16 sps:$4 sm:$0xff]   ;;  %v5936_v60 = vld [vmem:[#allocation5 + $0x34c] ss:$16 sps:$4 sm:$0xff]  }
 0x220   :  { %v2564_v21 = vmax.f32 %v5028_v62, 0.0  ;;  %v2566_v22 = vmax.f32 %v5060_v63, 0.0 }
 0x221   :  { %v2607_v23 = vpack.c.bf16 %v2563_v14, %v2559_v12  ;;  %v6424_v24 = vpack.c.bf16 %v2565_v15, %v2561_v13 }
 0x222   :  { %v2608_v25 = vpack.c.bf16 %v2564_v21, %v2560_v19  ;;  %v6426_v26 = vpack.c.bf16 %v2566_v22, %v2562_v20  ;;  %v2046_v27 = vpop.f32.mrb[20].mxu0  ;;  %v2498_v28 = vpop.f32.mrb[20].mxu1  ;;  %3541 = vmatpush1.bf16.msra.mxu0 %v5913_v3  ;;  %3767 = vmatpush1.bf16.msra.mxu1 %v5916_v10  ;;  %v5934_v19 = vld [vmem:[#allocation5 + $0x348] ss:$16 sps:$4 sm:$0xff]  }
 0x223   :  { %v5029_v31 = vadd.f32 %v2046_v27, %v6354_v6  ;;  %v5061_v32 = vadd.f32 %v2498_v28, %v6358_v7  ;;  %v2048_v33 = vpop.f32.mrb[21].mxu0  ;;  %v2500_v34 = vpop.f32.mrb[21].mxu1  ;;  %3542 = vmatprep.subr.bf16.mxu0 %v5921_v11  ;;  %3768 = vmatprep.subr.bf16.mxu1 %v5924_v17  ;;  %v5931_v17 = vld [vmem:[#allocation5 + $0x340] ss:$16 sps:$4 sm:$0xff]   ;;  %v5942_v27 = vld [vmem:[#allocation5 + $0x36c] ss:$16 sps:$4 sm:$0xff]  }
 0x224   :  { %v5030_v40 = vadd.f32 %v2048_v33, %v6362_v8  ;;  %v5062_v42 = vadd.f32 %v2500_v34, %v6366_v9  ;;  %v2050_v43 = vpop.f32.mrb[22].mxu0  ;;  %v2502_v44 = vpop.f32.mrb[22].mxu1  ;;  %3485 = vmatprep.mubr.bf16.mxu0 %v2608_v25  ;;  %3711 = vmatprep.mubr.bf16.mxu1 %v2608_v25  ;;  %v5939_v25 = vld [vmem:[#allocation5 + $0x364] ss:$16 sps:$4 sm:$0xff]  }
 0x225   :  { %v5031_v45 = vadd.f32 %v2050_v43, %v6354_v6  ;;  %v5063_v46 = vadd.f32 %v2502_v44, %v6358_v7  ;;  %v2052_v47 = vpop.f32.mrb[23].mxu0  ;;  %v2504_v48 = vpop.f32.mrb[23].mxu1  ;;  %3486 = vmatmul.mubr.bf16.gmra.mrb[48].mxu0 %v2607_v23  ;;  %3712 = vmatmul.mubr.bf16.gmra.mrb[48].mxu1 %v2607_v23  ;;  %v2567_v56 = vmax.f32 %v5029_v31, 0.0  ;;  %v2569_v57 = vmax.f32 %v5061_v32, 0.0  ;;  %v5940_v43 = vld [vmem:[#allocation5 + $0x368] ss:$16 sps:$4 sm:$0xff]  }
 0x226   :  { %v5032_v49 = vadd.f32 %v2052_v47, %v6362_v8  ;;  %v5064_v50 = vadd.f32 %v2504_v48, %v6366_v9  ;;  %3543 = vmatpush1.bf16.msra.mxu0 %v5919_v29  ;;  %3769 = vmatpush1.bf16.msra.mxu1 %v5922_v30  ;;  %v2568_v61 = vmax.f32 %v5030_v40, 0.0  ;;  %v2570_v62 = vmax.f32 %v5062_v42, 0.0  ;;  %v5937_v42 = vld [vmem:[#allocation5 + $0x360] ss:$16 sps:$4 sm:$0xff]   ;;  %v5945_v44 = vld [vmem:[#allocation5 + $0x384] ss:$16 sps:$4 sm:$0xff]  }
 0x227   :  { %v2571_v58 = vmax.f32 %v5031_v45, 0.0  ;;  %v2573_v59 = vmax.f32 %v5063_v46, 0.0  ;;  %3544 = vmatprep.subr.bf16.mxu0 %v5927_v36  ;;  %3770 = vmatprep.subr.bf16.mxu1 %v5930_v38 }
 0x228   :  { %v2572_v63 = vmax.f32 %v5032_v49, 0.0  ;;  %v2574_v3 = vmax.f32 %v5064_v50, 0.0  ;;  %v5948_v49 = vld [vmem:[#allocation5 + $0x38c] ss:$16 sps:$4 sm:$0xff]  }
 0x229   :  { %v2611_v10 = vpack.c.bf16 %v2571_v58, %v2567_v56  ;;  %v6436_v11 = vpack.c.bf16 %v2573_v59, %v2569_v57 }
 0x22a   :  { %v2612_v12 = vpack.c.bf16 %v2572_v63, %v2568_v61  ;;  %v6438_v13 = vpack.c.bf16 %v2574_v3, %v2570_v62  ;;  %v2056_v14 = vpop.f32.mrb[24].mxu0  ;;  %v2508_v15 = vpop.f32.mrb[24].mxu1  ;;  %3545 = vmatpush1.bf16.msra.mxu0 %v5925_v51  ;;  %3771 = vmatpush1.bf16.msra.mxu1 %v5928_v52  ;;  %v5943_v62 = vld [vmem:[#allocation5 + $0x380] ss:$16 sps:$4 sm:$0xff]   ;;  %v5946_v63 = vld [vmem:[#allocation5 + $0x388] ss:$16 sps:$4 sm:$0xff]  }
 0x22b   :  { %v5033_v20 = vadd.f32 %v2056_v14, %v6354_v6  ;;  %v5065_v21 = vadd.f32 %v2508_v15, %v6358_v7  ;;  %v2058_v22 = vpop.f32.mrb[25].mxu0  ;;  %v2510_v23 = vpop.f32.mrb[25].mxu1  ;;  %3546 = vmatprep.subr.bf16.mxu0 %v5933_v53  ;;  %3772 = vmatprep.subr.bf16.mxu1 %v5936_v60  ;;  %v5951_v15 = vld [vmem:[#allocation5 + $0x3a4] ss:$16 sps:$4 sm:$0xff]  }
 0x22c   :  { %v5034_v28 = vadd.f32 %v2058_v22, %v6362_v8  ;;  %v5066_v29 = vadd.f32 %v2510_v23, %v6366_v9  ;;  %v2060_v30 = vpop.f32.mrb[26].mxu0  ;;  %v2512_v31 = vpop.f32.mrb[26].mxu1  ;;  %3495 = vmatprep.mubr.bf16.mxu0 %v2612_v12  ;;  %3721 = vmatprep.mubr.bf16.mxu1 %v2612_v12 }
 0x22d   :  { %v5035_v32 = vadd.f32 %v2060_v30, %v6354_v6  ;;  %v5067_v33 = vadd.f32 %v2512_v31, %v6358_v7  ;;  %v2062_v34 = vpop.f32.mrb[27].mxu0  ;;  %v2514_v36 = vpop.f32.mrb[27].mxu1  ;;  %3496 = vmatmul.mubr.bf16.gmra.mrb[52].mxu0 %v2611_v10  ;;  %3722 = vmatmul.mubr.bf16.gmra.mrb[52].mxu1 %v2611_v10  ;;  %v2575_v45 = vmax.f32 %v5033_v20, 0.0  ;;  %v2577_v46 = vmax.f32 %v5065_v21, 0.0  ;;  %v5949_v31 = vld [vmem:[#allocation5 + $0x3a0] ss:$16 sps:$4 sm:$0xff]  }
 0x22e   :  { %v5036_v38 = vadd.f32 %v2062_v34, %v6362_v8  ;;  %v5068_v40 = vadd.f32 %v2514_v36, %v6366_v9  ;;  %3547 = vmatpush1.bf16.msra.mxu0 %v5931_v17  ;;  %3773 = vmatpush1.bf16.msra.mxu1 %v5934_v19  ;;  %v2576_v50 = vmax.f32 %v5034_v28, 0.0  ;;  %v2578_v51 = vmax.f32 %v5066_v29, 0.0  ;;  %v5954_v17 = vld [vmem:[#allocation5 + $0x3ac] ss:$16 sps:$4 sm:$0xff]  }
 0x22f   :  { %v2579_v47 = vmax.f32 %v5035_v32, 0.0  ;;  %v2581_v48 = vmax.f32 %v5067_v33, 0.0  ;;  %3548 = vmatprep.subr.bf16.mxu0 %v5939_v25  ;;  %3774 = vmatprep.subr.bf16.mxu1 %v5942_v27  ;;  %v5952_v32 = vld [vmem:[#allocation5 + $0x3a8] ss:$16 sps:$4 sm:$0xff]   ;;  %v5957_v33 = vld [vmem:[#allocation5 + $0x3c4] ss:$16 sps:$4 sm:$0xff]  }
 0x230   :  { %v2580_v52 = vmax.f32 %v5036_v38, 0.0  ;;  %v2582_v53 = vmax.f32 %v5068_v40, 0.0 }
 0x231   :  { %v2615_v56 = vpack.c.bf16 %v2579_v47, %v2575_v45  ;;  %v6448_v57 = vpack.c.bf16 %v2581_v48, %v2577_v46  ;;  %v5955_v47 = vld [vmem:[#allocation5 + $0x3c0] ss:$16 sps:$4 sm:$0xff]   ;;  %v5958_v48 = vld [vmem:[#allocation5 + $0x3c8] ss:$16 sps:$4 sm:$0xff]  }
 0x232   :  { %v2616_v58 = vpack.c.bf16 %v2580_v52, %v2576_v50  ;;  %v6450_v59 = vpack.c.bf16 %v2582_v53, %v2578_v51  ;;  %v2066_v60 = vpop.f32.mrb[28].mxu0  ;;  %v2518_v61 = vpop.f32.mrb[28].mxu1  ;;  %3549 = vmatpush1.bf16.msra.mxu0 %v5937_v42  ;;  %3775 = vmatpush1.bf16.msra.mxu1 %v5940_v43  ;;  %v5966_v50 = vld [vmem:[#allocation5 + $0x3ec] ss:$16 sps:$4 sm:$0xff]   ;;  %v5961_v51 = vld [vmem:[#allocation5 + $0x3e0] ss:$16 sps:$4 sm:$0xff]  }
 0x233   :  { %v5037_v3 = vadd.f32 %v2066_v60, %v6354_v6  ;;  %v5069_v10 = vadd.f32 %v2518_v61, %v6358_v7  ;;  %v2068_v12 = vpop.f32.mrb[29].mxu0  ;;  %v2520_v14 = vpop.f32.mrb[29].mxu1  ;;  %3550 = vmatprep.subr.bf16.mxu0 %v5945_v44  ;;  %3776 = vmatprep.subr.bf16.mxu1 %v5948_v49  ;;  %v5963_v49 = vld [vmem:[#allocation5 + $0x3e4] ss:$16 sps:$4 sm:$0xff]   ;;  %v5964_v52 = vld [vmem:[#allocation5 + $0x3e8] ss:$16 sps:$4 sm:$0xff]  }
 0x234   :  { %v5038_v19 = vadd.f32 %v2068_v12, %v6362_v8  ;;  %v5070_v20 = vadd.f32 %v2520_v14, %v6366_v9  ;;  %v2070_v21 = vpop.f32.mrb[30].mxu0  ;;  %v2522_v22 = vpop.f32.mrb[30].mxu1  ;;  %3505 = vmatprep.mubr.bf16.mxu0 %v2616_v58  ;;  %3731 = vmatprep.mubr.bf16.mxu1 %v2616_v58  ;;  %v5967_v53 = vld [vmem:[%s6713_s5 + $0x40] sm:$0xff]   ;;  %v5971_v60 = vld [vmem:[%s6713_s5 + $0x48] sm:$0xff]   ;;  %v5979_v12 = vld [vmem:[%s6713_s5 + $0x58] sm:$0xff]  }
 0x235   :  { %v5039_v23 = vadd.f32 %v2070_v21, %v6354_v6  ;;  %v5071_v25 = vadd.f32 %v2522_v22, %v6358_v7  ;;  %v2072_v27 = vpop.f32.mrb[31].mxu0  ;;  %v2524_v28 = vpop.f32.mrb[31].mxu1  ;;  %3506 = vmatmul.mubr.bf16.gmra.mrb[56].mxu0 %v2615_v56  ;;  %3732 = vmatmul.mubr.bf16.gmra.mrb[56].mxu1 %v2615_v56  ;;  %v2583_v34 = vmax.f32 %v5037_v3, 0.0  ;;  %v2585_v36 = vmax.f32 %v5069_v10, 0.0  ;;  %v5960_v6 = vld [vmem:[#allocation5 + $0x3cc] ss:$16 sps:$4 sm:$0xff]  }
 0x236   :  { %v5040_v29 = vadd.f32 %v2072_v27, %v6362_v8  ;;  %v5072_v30 = vadd.f32 %v2524_v28, %v6366_v9  ;;  %3551 = vmatpush1.bf16.msra.mxu0 %v5943_v62  ;;  %3777 = vmatpush1.bf16.msra.mxu1 %v5946_v63  ;;  %v2584_v7 = vmax.f32 %v5038_v19, 0.0  ;;  %v2586_v42 = vmax.f32 %v5070_v20, 0.0  ;;  %v5969_v56 = vld [vmem:[%s6713_s5 + $0xc0] sm:$0xff]   ;;  %v5973_v61 = vld [vmem:[%s6713_s5 + $0xc8] sm:$0xff]   ;;  %v5975_v3 = vld [vmem:[%s6713_s5 + $0x50] sm:$0xff]  }
 0x237   :  { %v2587_v38 = vmax.f32 %v5039_v23, 0.0  ;;  %v2589_v40 = vmax.f32 %v5071_v25, 0.0  ;;  %3552 = vmatprep.subr.bf16.mxu0 %v5951_v15  ;;  %3778 = vmatprep.subr.bf16.mxu1 %v5954_v17  ;;  %v5968_v58 = vld [vmem:[%s6713_s5] sm:$0xff]   ;;  %v5972_v62 = vld [vmem:[%s6713_s5 + $0x8] sm:$0xff]   ;;  %v5978_v10 = vld [vmem:[%s6713_s5 + $0x90] sm:$0xff]  }
 0x238   :  { %v2588_v43 = vmax.f32 %v5040_v29, 0.0  ;;  %v2590_v44 = vmax.f32 %v5072_v30, 0.0  ;;  %v5974_v63 = vld [vmem:[%s6713_s5 + $0x88] sm:$0xff]   ;;  %v5981_v14 = vld [vmem:[%s6713_s5 + $0xd8] sm:$0xff]   ;;  %v5983_v19 = vld [vmem:[%s6713_s5 + $0x60] sm:$0xff]  }
 0x239   :  { %v2619_v45 = vpack.c.bf16 %v2587_v38, %v2583_v34  ;;  %v6460_v8 = vpack.c.bf16 %v2589_v40, %v2585_v36  ;;  %v5980_v15 = vld [vmem:[%s6713_s5 + $0x18] sm:$0xff]   ;;  %v5986_v20 = vld [vmem:[%s6713_s5 + $0xa0] sm:$0xff]   ;;  %v5987_v21 = vld [vmem:[%s6713_s5 + $0x68] sm:$0xff]  }
 0x23a   :  { %v2620_v9 = vpack.c.bf16 %v2588_v43, %v2584_v7  ;;  %v6462_v46 = vpack.c.bf16 %v2590_v44, %v2586_v42  ;;  %3553 = vmatpush1.bf16.msra.mxu0 %v5949_v31  ;;  %3779 = vmatpush1.bf16.msra.mxu1 %v5952_v32  ;;  %v5982_v17 = vld [vmem:[%s6713_s5 + $0x98] sm:$0xff]   ;;  %v5989_v22 = vld [vmem:[%s6713_s5 + $0xe8] sm:$0xff]   ;;  %v5991_v27 = vld [vmem:[%s6713_s5 + $0x70] sm:$0xff]  }
 0x23b   :  { %3554 = vmatprep.subr.bf16.mxu0 %v5957_v33  ;;  %3780 = vmatprep.subr.bf16.mxu1 %v5960_v6  ;;  %v5988_v23 = vld [vmem:[%s6713_s5 + $0x28] sm:$0xff]   ;;  %v5994_v28 = vld [vmem:[%s6713_s5 + $0xb0] sm:$0xff]  }
 0x23c   :  { %3515 = vmatprep.mubr.bf16.mxu0 %v2620_v9  ;;  %3741 = vmatprep.mubr.bf16.mxu1 %v2620_v9  ;;  %v5990_v25 = vld [vmem:[%s6713_s5 + $0xa8] sm:$0xff]  }
 0x23d   :  { %3516 = vmatmul.mubr.bf16.gmra.mrb[60].mxu0 %v2619_v45  ;;  %3742 = vmatmul.mubr.bf16.gmra.mrb[60].mxu1 %v2619_v45 }
 0x23e   :  { %3555 = vmatpush1.bf16.msra.mxu0 %v5955_v47  ;;  %3558 = vmatprep.mubr.bf16.mxu0 %v6378_v37 }
 0x23f   :  { %3781 = vmatpush1.bf16.msra.mxu1 %v5958_v48  ;;  %3784 = vmatprep.mubr.bf16.mxu1 %v6378_v37  ;;  %v5970_v37 = vld [vmem:[%s6713_s5 + $0x80] sm:$0xff]  }
 0x240   :  { %3556 = vmatprep.subr.bf16.mxu0 %v5963_v49  ;;  %3782 = vmatprep.subr.bf16.mxu1 %v5966_v50 }
 0x242   :  { %3557 = vmatpush1.bf16.msra.mxu0 %v5961_v51 }
 0x243   :  { %3783 = vmatpush1.bf16.msra.mxu1 %v5964_v52  ;;  %4881 = vmatprep.subr.bf16.mxu0 %v5967_v53 }
 0x244   :  { %4945 = vmatprep.subr.bf16.mxu1 %v5969_v56 }
 0x245   :  { %3559 = vmatmul.mubr.bf16.vlgmr.msra.gmra.mrb[32].mxu0 %v6376_v35 }
 0x246   :  { %3785 = vmatmul.mubr.bf16.vlgmr.msra.gmra.mrb[32].mxu1 %v6376_v35  ;;  %3568 = vmatprep.mubr.bf16.mxu0 %v6390_v18  ;;  %v5977_v35 = vld [vmem:[%s6713_s5 + $0xd0] sm:$0xff]  }
 0x247   :  { %3794 = vmatprep.mubr.bf16.mxu1 %v6390_v18  ;;  %4882 = vmatpush3.bf16.msra.mxu0 %v5968_v58  ;;  %v5976_v18 = vld [vmem:[%s6713_s5 + $0x10] sm:$0xff]  }
 0x248   :  { %4946 = vmatpush3.bf16.msra.mxu1 %v5970_v37  ;;  %4883 = vmatprep.subr.bf16.mxu0 %v5971_v60 }
 0x249   :  { %4947 = vmatprep.subr.bf16.mxu1 %v5973_v61 }
 0x24b   :  { %4884 = vmatpush3.bf16.msra.mxu0 %v5972_v62 }
 0x24c   :  { %4948 = vmatpush3.bf16.msra.mxu1 %v5974_v63  ;;  %4885 = vmatprep.subr.bf16.mxu0 %v5975_v3 }
 0x24d   :  { %3569 = vmatmul.mubr.bf16.gmra.mrb[36].mxu0 %v6388_v16  ;;  %4949 = vmatprep.subr.bf16.mxu1 %v5977_v35 }
 0x24e   :  { %3795 = vmatmul.mubr.bf16.gmra.mrb[36].mxu1 %v6388_v16  ;;  %3578 = vmatprep.mubr.bf16.mxu0 %v6402_v54  ;;  %v5985_v16 = vld [vmem:[%s6713_s5 + $0xe0] sm:$0xff]  }
 0x24f   :  { %3804 = vmatprep.mubr.bf16.mxu1 %v6402_v54  ;;  %4886 = vmatpush3.bf16.msra.mxu0 %v5976_v18  ;;  %v5984_v54 = vld [vmem:[%s6713_s5 + $0x20] sm:$0xff]  }
 0x250   :  { %4950 = vmatpush3.bf16.msra.mxu1 %v5978_v10  ;;  %4887 = vmatprep.subr.bf16.mxu0 %v5979_v12 }
 0x251   :  { %4951 = vmatprep.subr.bf16.mxu1 %v5981_v14 }
 0x253   :  { %4888 = vmatpush3.bf16.msra.mxu0 %v5980_v15 }
 0x254   :  { %4952 = vmatpush3.bf16.msra.mxu1 %v5982_v17  ;;  %4889 = vmatprep.subr.bf16.mxu0 %v5983_v19 }
 0x255   :  { %3579 = vmatmul.mubr.bf16.gmra.mrb[40].mxu0 %v6400_v55  ;;  %4953 = vmatprep.subr.bf16.mxu1 %v5985_v16 }
 0x256   :  { %3805 = vmatmul.mubr.bf16.gmra.mrb[40].mxu1 %v6400_v55  ;;  %3588 = vmatprep.mubr.bf16.mxu0 %v6414_v41  ;;  %v5993_v55 = vld [vmem:[%s6713_s5 + $0xf0] sm:$0xff]  }
 0x257   :  { %3814 = vmatprep.mubr.bf16.mxu1 %v6414_v41  ;;  %4890 = vmatpush3.bf16.msra.mxu0 %v5984_v54  ;;  %v5992_v41 = vld [vmem:[%s6713_s5 + $0x30] sm:$0xff]  }
 0x258   :  { %4954 = vmatpush3.bf16.msra.mxu1 %v5986_v20  ;;  %4891 = vmatprep.subr.bf16.mxu0 %v5987_v21 }
 0x259   :  { %4955 = vmatprep.subr.bf16.mxu1 %v5989_v22 }
 0x25b   :  { %4892 = vmatpush3.bf16.msra.mxu0 %v5988_v23 }
 0x25c   :  { %4956 = vmatpush3.bf16.msra.mxu1 %v5990_v25  ;;  %4893 = vmatprep.subr.bf16.mxu0 %v5991_v27 }
 0x25d   :  { %3589 = vmatmul.mubr.bf16.gmra.mrb[44].mxu0 %v6412_v39  ;;  %4957 = vmatprep.subr.bf16.mxu1 %v5993_v55 }
 0x25e   :  { %3815 = vmatmul.mubr.bf16.gmra.mrb[44].mxu1 %v6412_v39  ;;  %3598 = vmatprep.mubr.bf16.mxu0 %v6426_v26  ;;  %v5995_v39 = vld [vmem:[%s6713_s5 + $0x78] sm:$0xff]  }
 0x25f   :  { %3824 = vmatprep.mubr.bf16.mxu1 %v6426_v26  ;;  %4894 = vmatpush3.bf16.msra.mxu0 %v5992_v41  ;;  %v5996_v26 = vld [vmem:[%s6713_s5 + $0x38] sm:$0xff]  }
 0x260   :  { %4958 = vmatpush3.bf16.msra.mxu1 %v5994_v28  ;;  %4895 = vmatprep.subr.bf16.mxu0 %v5995_v39 }
 0x263   :  { %4896 = vmatpush3.bf16.msra.mxu0 %v5996_v26 }
 0x265   :  { %3599 = vmatmul.mubr.bf16.gmra.mrb[48].mxu0 %v6424_v24 }
 0x266   :  { %3825 = vmatmul.mubr.bf16.gmra.mrb[48].mxu1 %v6424_v24  ;;  %3608 = vmatprep.mubr.bf16.mxu0 %v6438_v13  ;;  %v5997_v24 = vld [vmem:[%s6713_s5 + $0xf8] sm:$0xff]  }
 0x267   :  { %3834 = vmatprep.mubr.bf16.mxu1 %v6438_v13  ;;  %4959 = vmatprep.subr.bf16.mxu1 %v5997_v24  ;;  %v2751_v13 = vld [vmem:[%s6712_s4] sm:$0xf] }
 0x268   :  { %v6605_v29 = vrot.slane %v2751_v13, %v324_v4  ;;  %v6609_v30 = vrot.slane %v2751_v13, %v332_v5 }
 0x26d   :  { %3609 = vmatmul.mubr.bf16.gmra.mrb[52].mxu0 %v6436_v11 }
 0x26e   :  { %3835 = vmatmul.mubr.bf16.gmra.mrb[52].mxu1 %v6436_v11  ;;  %3618 = vmatprep.mubr.bf16.mxu0 %v6450_v59  ;;  %v5998_v11 = vld [vmem:[%s6713_s5 + $0xb8] sm:$0xff]  }
 0x26f   :  { %3844 = vmatprep.mubr.bf16.mxu1 %v6450_v59  ;;  %4960 = vmatpush3.bf16.msra.mxu1 %v5998_v11  ;;  %v6601_v59 = vrot.slane %v2751_v13, %v328_v2 }
 0x275   :  { %3619 = vmatmul.mubr.bf16.gmra.mrb[56].mxu0 %v6448_v57 }
 0x276   :  { %3845 = vmatmul.mubr.bf16.gmra.mrb[56].mxu1 %v6448_v57  ;;  %3628 = vmatprep.mubr.bf16.mxu0 %v6462_v46  ;;  %v6597_v57 = vrot.slane %v2751_v13, %v320_v1 }
 0x277   :  { %3854 = vmatprep.mubr.bf16.mxu1 %v6462_v46 }
 0x27d   :  { %3629 = vmatmul.mubr.bf16.gmra.mrb[60].mxu0 %v6460_v8 }
 0x27e   :  { %3855 = vmatmul.mubr.bf16.gmra.mrb[60].mxu1 %v6460_v8 }
 0x318   :  { %v3560_v31 = vpop.f32.mrb[32].mxu0 }
 0x319   :  { %v5073_v32 = vadd.f32 %v3560_v31, %v6597_v57  ;;  %v3786_v33 = vpop.f32.mrb[32].mxu1  ;;  %v3562_v34 = vpop.f32.mrb[33].mxu0 }
 0x31a   :  { %v5105_v1 = vadd.f32 %v3786_v33, %v6601_v59  ;;  %v5074_v36 = vadd.f32 %v3562_v34, %v6605_v29  ;;  %v3788_v38 = vpop.f32.mrb[33].mxu1  ;;  %v3564_v2 = vpop.f32.mrb[34].mxu0 }
 0x31b   :  { %v5106_v40 = vadd.f32 %v3788_v38, %v6609_v30  ;;  %v5075_v4 = vadd.f32 %v3564_v2, %v6597_v57  ;;  %v3790_v6 = vpop.f32.mrb[34].mxu1  ;;  %v3566_v7 = vpop.f32.mrb[35].mxu0  ;;  %v3865_v43 = vmax.f32 %v5073_v32, 0.0 }
 0x31c   :  { %v5107_v0 = vadd.f32 %v3790_v6, %v6601_v59  ;;  %v5076_v5 = vadd.f32 %v3566_v7, %v6605_v29  ;;  %v3792_v42 = vpop.f32.mrb[35].mxu1  ;;  %v3867_v8 = vmax.f32 %v5105_v1, 0.0  ;;  %v3866_v9 = vmax.f32 %v5074_v36, 0.0 }
 0x31d   :  { %v3869_v44 = vmax.f32 %v5075_v4, 0.0  ;;  %v5108_v45 = vadd.f32 %v3792_v42, %v6609_v30  ;;  %v3868_v48 = vmax.f32 %v5106_v40, 0.0 }
 0x31e   :  { %v3871_v46 = vmax.f32 %v5107_v0, 0.0  ;;  %v3870_v47 = vmax.f32 %v5076_v5, 0.0 }
 0x31f   :  { %v3929_v49 = vpack.c.bf16 %v3869_v44, %v3865_v43  ;;  %v3872_v50 = vmax.f32 %v5108_v45, 0.0 }
 0x320   :  { %v3931_v51 = vpack.c.bf16 %v3871_v46, %v3867_v8  ;;  %v3930_v52 = vpack.c.bf16 %v3870_v47, %v3866_v9  ;;  %v3570_v53 = vpop.f32.mrb[36].mxu0 }
 0x321   :  { %v3932_v56 = vpack.c.bf16 %v3872_v50, %v3868_v48  ;;  %v5077_v58 = vadd.f32 %v3570_v53, %v6597_v57  ;;  %v3796_v37 = vpop.f32.mrb[36].mxu1  ;;  %v3572_v60 = vpop.f32.mrb[37].mxu0 }
 0x322   :  { %v5109_v61 = vadd.f32 %v3796_v37, %v6601_v59  ;;  %v5078_v62 = vadd.f32 %v3572_v60, %v6605_v29  ;;  %v3798_v63 = vpop.f32.mrb[37].mxu1  ;;  %v3574_v3 = vpop.f32.mrb[38].mxu0  ;;  %4256 = vmatprep.mubr.bf16.mxu0 %v3930_v52 }
 0x323   :  { %v5110_v35 = vadd.f32 %v3798_v63, %v6609_v30  ;;  %v5079_v18 = vadd.f32 %v3574_v3, %v6597_v57  ;;  %v3800_v10 = vpop.f32.mrb[38].mxu1  ;;  %4353 = vmatprep.mubr.bf16.mxu1 %v3932_v56  ;;  %v3576_v12 = vpop.f32.mrb[39].mxu0  ;;  %4257 = vmatmul.mubr.bf16.vlgmr.msra.gmra.mrb[64].mxu0 %v3929_v49  ;;  %v3873_v19 = vmax.f32 %v5077_v58, 0.0 }
 0x324   :  { %v5111_v14 = vadd.f32 %v3800_v10, %v6601_v59  ;;  %v5080_v15 = vadd.f32 %v3576_v12, %v6605_v29  ;;  %v3802_v17 = vpop.f32.mrb[39].mxu1  ;;  %4354 = vmatmul.mubr.bf16.vlgmr.msra.gmra.mrb[64].mxu1 %v3931_v51  ;;  %v3875_v20 = vmax.f32 %v5109_v61, 0.0  ;;  %v3874_v21 = vmax.f32 %v5078_v62, 0.0 }
 0x325   :  { %v3877_v16 = vmax.f32 %v5079_v18, 0.0  ;;  %v5112_v54 = vadd.f32 %v3802_v17, %v6609_v30  ;;  %v3876_v25 = vmax.f32 %v5110_v35, 0.0 }
 0x326   :  { %v3879_v22 = vmax.f32 %v5111_v14, 0.0  ;;  %v3878_v23 = vmax.f32 %v5080_v15, 0.0 }
 0x327   :  { %v3933_v27 = vpack.c.bf16 %v3877_v16, %v3873_v19  ;;  %v3880_v55 = vmax.f32 %v5112_v54, 0.0 }
 0x328   :  { %v3935_v41 = vpack.c.bf16 %v3879_v22, %v3875_v20  ;;  %v3934_v28 = vpack.c.bf16 %v3878_v23, %v3874_v21  ;;  %v3580_v39 = vpop.f32.mrb[40].mxu0 }
 0x329   :  { %v3936_v24 = vpack.c.bf16 %v3880_v55, %v3876_v25  ;;  %v5081_v26 = vadd.f32 %v3580_v39, %v6597_v57  ;;  %v3806_v11 = vpop.f32.mrb[40].mxu1  ;;  %v3582_v13 = vpop.f32.mrb[41].mxu0 }
 0x32a   :  { %v5113_v31 = vadd.f32 %v3806_v11, %v6601_v59  ;;  %v5082_v32 = vadd.f32 %v3582_v13, %v6605_v29  ;;  %v3808_v33 = vpop.f32.mrb[41].mxu1  ;;  %v3584_v34 = vpop.f32.mrb[42].mxu0  ;;  %4264 = vmatprep.mubr.bf16.mxu0 %v3934_v28 }
 0x32b   :  { %v5114_v1 = vadd.f32 %v3808_v33, %v6609_v30  ;;  %v5083_v36 = vadd.f32 %v3584_v34, %v6597_v57  ;;  %v3810_v38 = vpop.f32.mrb[42].mxu1  ;;  %4361 = vmatprep.mubr.bf16.mxu1 %v3936_v24  ;;  %v3586_v2 = vpop.f32.mrb[43].mxu0  ;;  %4265 = vmatmul.mubr.bf16.gmra.mrb[68].mxu0 %v3933_v27  ;;  %v3881_v7 = vmax.f32 %v5081_v26, 0.0 }
 0x32c   :  { %v5115_v40 = vadd.f32 %v3810_v38, %v6601_v59  ;;  %v5084_v4 = vadd.f32 %v3586_v2, %v6605_v29  ;;  %v3812_v6 = vpop.f32.mrb[43].mxu1  ;;  %4362 = vmatmul.mubr.bf16.gmra.mrb[68].mxu1 %v3935_v41  ;;  %v3883_v42 = vmax.f32 %v5113_v31, 0.0  ;;  %v3882_v43 = vmax.f32 %v5082_v32, 0.0 }
 0x32d   :  { %v3885_v0 = vmax.f32 %v5083_v36, 0.0  ;;  %v5116_v5 = vadd.f32 %v3812_v6, %v6609_v30  ;;  %v3884_v8 = vmax.f32 %v5114_v1, 0.0 }
 0x32e   :  { %v3887_v44 = vmax.f32 %v5115_v40, 0.0  ;;  %v3886_v45 = vmax.f32 %v5084_v4, 0.0 }
 0x32f   :  { %v3937_v9 = vpack.c.bf16 %v3885_v0, %v3881_v7  ;;  %v3888_v46 = vmax.f32 %v5116_v5, 0.0 }
 0x330   :  { %v3939_v47 = vpack.c.bf16 %v3887_v44, %v3883_v42  ;;  %v3938_v48 = vpack.c.bf16 %v3886_v45, %v3882_v43  ;;  %v3590_v49 = vpop.f32.mrb[44].mxu0 }
 0x331   :  { %v3940_v50 = vpack.c.bf16 %v3888_v46, %v3884_v8  ;;  %v5085_v51 = vadd.f32 %v3590_v49, %v6597_v57  ;;  %v3816_v52 = vpop.f32.mrb[44].mxu1  ;;  %v3592_v53 = vpop.f32.mrb[45].mxu0 }
 0x332   :  { %v5117_v56 = vadd.f32 %v3816_v52, %v6601_v59  ;;  %v5086_v58 = vadd.f32 %v3592_v53, %v6605_v29  ;;  %v3818_v37 = vpop.f32.mrb[45].mxu1  ;;  %v3594_v60 = vpop.f32.mrb[46].mxu0  ;;  %4272 = vmatprep.mubr.bf16.mxu0 %v3938_v48 }
 0x333   :  { %v5118_v61 = vadd.f32 %v3818_v37, %v6609_v30  ;;  %v5087_v62 = vadd.f32 %v3594_v60, %v6597_v57  ;;  %v3820_v63 = vpop.f32.mrb[46].mxu1  ;;  %4369 = vmatprep.mubr.bf16.mxu1 %v3940_v50  ;;  %v3596_v3 = vpop.f32.mrb[47].mxu0  ;;  %4273 = vmatmul.mubr.bf16.gmra.mrb[72].mxu0 %v3937_v9  ;;  %v3889_v12 = vmax.f32 %v5085_v51, 0.0 }
 0x334   :  { %v5119_v35 = vadd.f32 %v3820_v63, %v6601_v59  ;;  %v5088_v18 = vadd.f32 %v3596_v3, %v6605_v29  ;;  %v3822_v10 = vpop.f32.mrb[47].mxu1  ;;  %4370 = vmatmul.mubr.bf16.gmra.mrb[72].mxu1 %v3939_v47  ;;  %v3891_v17 = vmax.f32 %v5117_v56, 0.0  ;;  %v3890_v19 = vmax.f32 %v5086_v58, 0.0 }
 0x335   :  { %v3893_v14 = vmax.f32 %v5087_v62, 0.0  ;;  %v5120_v15 = vadd.f32 %v3822_v10, %v6609_v30  ;;  %v3892_v20 = vmax.f32 %v5118_v61, 0.0 }
 0x336   :  { %v3895_v16 = vmax.f32 %v5119_v35, 0.0  ;;  %v3894_v54 = vmax.f32 %v5088_v18, 0.0 }
 0x337   :  { %v3941_v21 = vpack.c.bf16 %v3893_v14, %v3889_v12  ;;  %v3896_v22 = vmax.f32 %v5120_v15, 0.0 }
 0x338   :  { %v3943_v23 = vpack.c.bf16 %v3895_v16, %v3891_v17  ;;  %v3942_v25 = vpack.c.bf16 %v3894_v54, %v3890_v19  ;;  %v3600_v27 = vpop.f32.mrb[48].mxu0 }
 0x339   :  { %v3944_v55 = vpack.c.bf16 %v3896_v22, %v3892_v20  ;;  %v5089_v41 = vadd.f32 %v3600_v27, %v6597_v57  ;;  %v3826_v28 = vpop.f32.mrb[48].mxu1  ;;  %v3602_v39 = vpop.f32.mrb[49].mxu0 }
 0x33a   :  { %v5121_v24 = vadd.f32 %v3826_v28, %v6601_v59  ;;  %v5090_v26 = vadd.f32 %v3602_v39, %v6605_v29  ;;  %v3828_v11 = vpop.f32.mrb[49].mxu1  ;;  %v3604_v13 = vpop.f32.mrb[50].mxu0  ;;  %4280 = vmatprep.mubr.bf16.mxu0 %v3942_v25 }
 0x33b   :  { %v5122_v31 = vadd.f32 %v3828_v11, %v6609_v30  ;;  %v5091_v32 = vadd.f32 %v3604_v13, %v6597_v57  ;;  %v3830_v33 = vpop.f32.mrb[50].mxu1  ;;  %4377 = vmatprep.mubr.bf16.mxu1 %v3944_v55  ;;  %v3606_v34 = vpop.f32.mrb[51].mxu0  ;;  %4281 = vmatmul.mubr.bf16.gmra.mrb[76].mxu0 %v3941_v21  ;;  %v3897_v2 = vmax.f32 %v5089_v41, 0.0 }
 0x33c   :  { %v5123_v1 = vadd.f32 %v3830_v33, %v6601_v59  ;;  %v5092_v36 = vadd.f32 %v3606_v34, %v6605_v29  ;;  %v3832_v38 = vpop.f32.mrb[51].mxu1  ;;  %4378 = vmatmul.mubr.bf16.gmra.mrb[76].mxu1 %v3943_v23  ;;  %v3899_v6 = vmax.f32 %v5121_v24, 0.0  ;;  %v3898_v7 = vmax.f32 %v5090_v26, 0.0 }
 0x33d   :  { %v3901_v40 = vmax.f32 %v5091_v32, 0.0  ;;  %v5124_v4 = vadd.f32 %v3832_v38, %v6609_v30  ;;  %v3900_v42 = vmax.f32 %v5122_v31, 0.0 }
 0x33e   :  { %v3903_v0 = vmax.f32 %v5123_v1, 0.0  ;;  %v3902_v5 = vmax.f32 %v5092_v36, 0.0 }
 0x33f   :  { %v3945_v43 = vpack.c.bf16 %v3901_v40, %v3897_v2  ;;  %v3904_v44 = vmax.f32 %v5124_v4, 0.0 }
 0x340   :  { %v3947_v45 = vpack.c.bf16 %v3903_v0, %v3899_v6  ;;  %v3946_v8 = vpack.c.bf16 %v3902_v5, %v3898_v7  ;;  %v3610_v9 = vpop.f32.mrb[52].mxu0 }
 0x341   :  { %v3948_v46 = vpack.c.bf16 %v3904_v44, %v3900_v42  ;;  %v5093_v47 = vadd.f32 %v3610_v9, %v6597_v57  ;;  %v3836_v48 = vpop.f32.mrb[52].mxu1  ;;  %v3612_v49 = vpop.f32.mrb[53].mxu0 }
 0x342   :  { %v5125_v50 = vadd.f32 %v3836_v48, %v6601_v59  ;;  %v5094_v51 = vadd.f32 %v3612_v49, %v6605_v29  ;;  %v3838_v52 = vpop.f32.mrb[53].mxu1  ;;  %v3614_v53 = vpop.f32.mrb[54].mxu0  ;;  %4288 = vmatprep.mubr.bf16.mxu0 %v3946_v8 }
 0x343   :  { %v5126_v56 = vadd.f32 %v3838_v52, %v6609_v30  ;;  %v5095_v58 = vadd.f32 %v3614_v53, %v6597_v57  ;;  %v3840_v37 = vpop.f32.mrb[54].mxu1  ;;  %4385 = vmatprep.mubr.bf16.mxu1 %v3948_v46  ;;  %v3616_v60 = vpop.f32.mrb[55].mxu0  ;;  %4289 = vmatmul.mubr.bf16.gmra.mrb[80].mxu0 %v3945_v43  ;;  %v3905_v3 = vmax.f32 %v5093_v47, 0.0 }
 0x344   :  { %v5127_v61 = vadd.f32 %v3840_v37, %v6601_v59  ;;  %v5096_v62 = vadd.f32 %v3616_v60, %v6605_v29  ;;  %v3842_v63 = vpop.f32.mrb[55].mxu1  ;;  %4386 = vmatmul.mubr.bf16.gmra.mrb[80].mxu1 %v3947_v45  ;;  %v3907_v10 = vmax.f32 %v5125_v50, 0.0  ;;  %v3906_v12 = vmax.f32 %v5094_v51, 0.0 }
 0x345   :  { %v3909_v35 = vmax.f32 %v5095_v58, 0.0  ;;  %v5128_v18 = vadd.f32 %v3842_v63, %v6609_v30  ;;  %v3908_v17 = vmax.f32 %v5126_v56, 0.0 }
 0x346   :  { %v3911_v14 = vmax.f32 %v5127_v61, 0.0  ;;  %v3910_v15 = vmax.f32 %v5096_v62, 0.0 }
 0x347   :  { %v3949_v19 = vpack.c.bf16 %v3909_v35, %v3905_v3  ;;  %v3912_v16 = vmax.f32 %v5128_v18, 0.0 }
 0x348   :  { %v3951_v54 = vpack.c.bf16 %v3911_v14, %v3907_v10  ;;  %v3950_v20 = vpack.c.bf16 %v3910_v15, %v3906_v12  ;;  %v3620_v21 = vpop.f32.mrb[56].mxu0 }
 0x349   :  { %v3952_v22 = vpack.c.bf16 %v3912_v16, %v3908_v17  ;;  %v5097_v23 = vadd.f32 %v3620_v21, %v6597_v57  ;;  %v3846_v25 = vpop.f32.mrb[56].mxu1  ;;  %v3622_v27 = vpop.f32.mrb[57].mxu0 }
 0x34a   :  { %v5129_v55 = vadd.f32 %v3846_v25, %v6601_v59  ;;  %v5098_v41 = vadd.f32 %v3622_v27, %v6605_v29  ;;  %v3848_v28 = vpop.f32.mrb[57].mxu1  ;;  %v3624_v39 = vpop.f32.mrb[58].mxu0  ;;  %4296 = vmatprep.mubr.bf16.mxu0 %v3950_v20 }
 0x34b   :  { %v5130_v24 = vadd.f32 %v3848_v28, %v6609_v30  ;;  %v5099_v26 = vadd.f32 %v3624_v39, %v6597_v57  ;;  %v3850_v11 = vpop.f32.mrb[58].mxu1  ;;  %4393 = vmatprep.mubr.bf16.mxu1 %v3952_v22  ;;  %v3626_v13 = vpop.f32.mrb[59].mxu0  ;;  %4297 = vmatmul.mubr.bf16.gmra.mrb[84].mxu0 %v3949_v19  ;;  %v3913_v34 = vmax.f32 %v5097_v23, 0.0 }
 0x34c   :  { %v5131_v31 = vadd.f32 %v3850_v11, %v6601_v59  ;;  %v5100_v32 = vadd.f32 %v3626_v13, %v6605_v29  ;;  %v3852_v33 = vpop.f32.mrb[59].mxu1  ;;  %4394 = vmatmul.mubr.bf16.gmra.mrb[84].mxu1 %v3951_v54  ;;  %v3915_v38 = vmax.f32 %v5129_v55, 0.0  ;;  %v3914_v2 = vmax.f32 %v5098_v41, 0.0 }
 0x34d   :  { %v3917_v1 = vmax.f32 %v5099_v26, 0.0  ;;  %v5132_v36 = vadd.f32 %v3852_v33, %v6609_v30  ;;  %v3916_v6 = vmax.f32 %v5130_v24, 0.0 }
 0x34e   :  { %v3919_v40 = vmax.f32 %v5131_v31, 0.0  ;;  %v3918_v4 = vmax.f32 %v5100_v32, 0.0 }
 0x34f   :  { %v3953_v7 = vpack.c.bf16 %v3917_v1, %v3913_v34  ;;  %v3920_v0 = vmax.f32 %v5132_v36, 0.0 }
 0x350   :  { %v3955_v5 = vpack.c.bf16 %v3919_v40, %v3915_v38  ;;  %v3954_v42 = vpack.c.bf16 %v3918_v4, %v3914_v2  ;;  %v3630_v43 = vpop.f32.mrb[60].mxu0 }
 0x351   :  { %v3956_v44 = vpack.c.bf16 %v3920_v0, %v3916_v6  ;;  %v5101_v45 = vadd.f32 %v3630_v43, %v6597_v57  ;;  %v3856_v8 = vpop.f32.mrb[60].mxu1  ;;  %v3632_v9 = vpop.f32.mrb[61].mxu0 }
 0x352   :  { %v5133_v46 = vadd.f32 %v3856_v8, %v6601_v59  ;;  %v5102_v47 = vadd.f32 %v3632_v9, %v6605_v29  ;;  %v3858_v48 = vpop.f32.mrb[61].mxu1  ;;  %v3634_v49 = vpop.f32.mrb[62].mxu0  ;;  %4304 = vmatprep.mubr.bf16.mxu0 %v3954_v42 }
 0x353   :  { %v5134_v50 = vadd.f32 %v3858_v48, %v6609_v30  ;;  %v5103_v51 = vadd.f32 %v3634_v49, %v6597_v57  ;;  %v3860_v52 = vpop.f32.mrb[62].mxu1  ;;  %4401 = vmatprep.mubr.bf16.mxu1 %v3956_v44  ;;  %v3636_v53 = vpop.f32.mrb[63].mxu0  ;;  %4305 = vmatmul.mubr.bf16.gmra.mrb[88].mxu0 %v3953_v7  ;;  %v3921_v60 = vmax.f32 %v5101_v45, 0.0 }
 0x354   :  { %v5135_v56 = vadd.f32 %v3860_v52, %v6601_v59  ;;  %v5104_v58 = vadd.f32 %v3636_v53, %v6605_v29  ;;  %v3862_v37 = vpop.f32.mrb[63].mxu1  ;;  %4402 = vmatmul.mubr.bf16.gmra.mrb[88].mxu1 %v3955_v5  ;;  %v3923_v63 = vmax.f32 %v5133_v46, 0.0  ;;  %v3922_v3 = vmax.f32 %v5102_v47, 0.0 }
 0x355   :  { %v3925_v61 = vmax.f32 %v5103_v51, 0.0  ;;  %v5136_v62 = vadd.f32 %v3862_v37, %v6609_v30  ;;  %v3924_v10 = vmax.f32 %v5134_v50, 0.0  ;;  %v6678_v30 = vld [vmem:[%s6714_s6] ss:$0 sm:$0xff]  ;;  %s6076_s6 = smov [#allocation7]  }
 0x356   :  { %v3927_v35 = vmax.f32 %v5135_v56, 0.0  ;;  %v3926_v18 = vmax.f32 %v5104_v58, 0.0  ;;  %s4439_s25 = sshll.u32 %s6076_s6, 4  ;;  %s4440_s25 = int_to_ptr.vmem [resolvable:$true] %s4439_s25 }
 0x357   :  { %v3957_v57 = vpack.c.bf16 %v3925_v61, %v3921_v60  ;;  %v3928_v12 = vmax.f32 %v5136_v62, 0.0  ;;  %s6043_s3 = scalar_lea.vmem %s4440_s25, 2048  ;;  %p6048_p3 = scmp.lt.s32.totalorder %s4440_s25, %s4440_s25 }
 0x358   :  { %v3959_v14 = vpack.c.bf16 %v3927_v35, %v3923_v63  ;;  %v3958_v15 = vpack.c.bf16 %v3926_v18, %v3922_v3  ;;  %p6044_p2 = scmp.ne.s32.totalorder %s4440_s25, %s6043_s3  ;;  %p6049_p4 = scmp.lt.s32.totalorder %s6043_s3, %s6043_s3 }
 0x359   :  { %v3960_v17 = vpack.c.bf16 %v3928_v12, %v3924_v10 }
 0x35a   :  { %4312 = vmatprep.mubr.bf16.mxu0 %v3958_v15  ;;  %p6050_p5 = por %p6049_p4, %p6048_p3 }
 0x35b   :  { %4409 = vmatprep.mubr.bf16.mxu1 %v3960_v17  ;;  %4313 = vmatmul.mubr.bf16.gmra.mrb[92].mxu0 %v3957_v57 }
 0x35c   :  { %4410 = vmatmul.mubr.bf16.gmra.mrb[92].mxu1 %v3959_v14  ;;  %p6051_p6 = pnand %p6050_p5, %p6044_p2 }
 0x3f6   :  { %v4897_v59 = vpop.f32.mrb[64].mxu0 }
 0x3f7   :  { %v4961_v29 = vpop.f32.mrb[64].mxu1  ;;  %v4898_v19 = vpop.f32.mrb[65].mxu0 }
 0x3f8   :  { %v4899_v16 = vadd.f32 %v4898_v19, %v4897_v59  ;;  %v4962_v54 = vpop.f32.mrb[65].mxu1  ;;  %v4900_v20 = vpop.f32.mrb[66].mxu0 }
 0x3f9   :  { %v4963_v21 = vadd.f32 %v4962_v54, %v4961_v29  ;;  %v4964_v22 = vpop.f32.mrb[66].mxu1  ;;  %v4901_v23 = vpop.f32.mrb[67].mxu0 }
 0x3fa   :  { %v4259_v25 = vadd.f32 %v4899_v16, %v6678_v30  ;;  %v4902_v27 = vadd.f32 %v4901_v23, %v4900_v20  ;;  %v4965_v55 = vpop.f32.mrb[67].mxu1 }
 0x3fb   :  { %v4966_v41 = vadd.f32 %v4965_v55, %v4964_v22 }
 0x3fc   :  { %v4356_v28 = vadd.f32 %v4963_v21, %v4259_v25  ;;  %v4262_v39 = vadd.f32 %v4902_v27, %v6678_v30 }
 0x3fe   :  { %4418 = vst [vmem:[#allocation7] sm:$0xff] %v4356_v28  ;;  %v4359_v24 = vadd.f32 %v4966_v41, %v4262_v39  ;;  %v4903_v26 = vpop.f32.mrb[68].mxu0 }
 0x3ff   :  { %v4967_v11 = vpop.f32.mrb[68].mxu1  ;;  %v4904_v13 = vpop.f32.mrb[69].mxu0 }
 0x400   :  { %4419 = vst [vmem:[#allocation7 + $0x8] sm:$0xff] %v4359_v24  ;;  %v4905_v31 = vadd.f32 %v4904_v13, %v4903_v26  ;;  %v4968_v32 = vpop.f32.mrb[69].mxu1  ;;  %v4906_v33 = vpop.f32.mrb[70].mxu0 }
 0x401   :  { %v4969_v34 = vadd.f32 %v4968_v32, %v4967_v11  ;;  %v4970_v1 = vpop.f32.mrb[70].mxu1  ;;  %v4907_v36 = vpop.f32.mrb[71].mxu0 }
 0x402   :  { %v4267_v38 = vadd.f32 %v4905_v31, %v6678_v30  ;;  %v4908_v2 = vadd.f32 %v4907_v36, %v4906_v33  ;;  %v4971_v40 = vpop.f32.mrb[71].mxu1 }
 0x403   :  { %v4972_v4 = vadd.f32 %v4971_v40, %v4970_v1 }
 0x404   :  { %v4364_v6 = vadd.f32 %v4969_v34, %v4267_v38  ;;  %v4270_v7 = vadd.f32 %v4908_v2, %v6678_v30 }
 0x406   :  { %4420 = vst [vmem:[#allocation7 + $0x10] sm:$0xff] %v4364_v6  ;;  %v4367_v0 = vadd.f32 %v4972_v4, %v4270_v7  ;;  %v4909_v5 = vpop.f32.mrb[72].mxu0 }
 0x407   :  { %v4973_v42 = vpop.f32.mrb[72].mxu1  ;;  %v4910_v43 = vpop.f32.mrb[73].mxu0 }
 0x408   :  { %4421 = vst [vmem:[#allocation7 + $0x18] sm:$0xff] %v4367_v0  ;;  %v4911_v44 = vadd.f32 %v4910_v43, %v4909_v5  ;;  %v4974_v45 = vpop.f32.mrb[73].mxu1  ;;  %v4912_v8 = vpop.f32.mrb[74].mxu0 }
 0x409   :  { %v4975_v9 = vadd.f32 %v4974_v45, %v4973_v42  ;;  %v4976_v46 = vpop.f32.mrb[74].mxu1  ;;  %v4913_v47 = vpop.f32.mrb[75].mxu0 }
 0x40a   :  { %v4275_v48 = vadd.f32 %v4911_v44, %v6678_v30  ;;  %v4914_v49 = vadd.f32 %v4913_v47, %v4912_v8  ;;  %v4977_v50 = vpop.f32.mrb[75].mxu1 }
 0x40b   :  { %v4978_v51 = vadd.f32 %v4977_v50, %v4976_v46 }
 0x40c   :  { %v4372_v52 = vadd.f32 %v4975_v9, %v4275_v48  ;;  %v4278_v53 = vadd.f32 %v4914_v49, %v6678_v30 }
 0x40e   :  { %4422 = vst [vmem:[#allocation7 + $0x20] sm:$0xff] %v4372_v52  ;;  %v4375_v56 = vadd.f32 %v4978_v51, %v4278_v53  ;;  %v4915_v58 = vpop.f32.mrb[76].mxu0 }
 0x40f   :  { %v4979_v37 = vpop.f32.mrb[76].mxu1  ;;  %v4916_v60 = vpop.f32.mrb[77].mxu0 }
 0x410   :  { %4423 = vst [vmem:[#allocation7 + $0x28] sm:$0xff] %v4375_v56  ;;  %v4917_v61 = vadd.f32 %v4916_v60, %v4915_v58  ;;  %v4980_v62 = vpop.f32.mrb[77].mxu1  ;;  %v4918_v63 = vpop.f32.mrb[78].mxu0 }
 0x411   :  { %v4981_v3 = vadd.f32 %v4980_v62, %v4979_v37  ;;  %v4982_v35 = vpop.f32.mrb[78].mxu1  ;;  %v4919_v18 = vpop.f32.mrb[79].mxu0 }
 0x412   :  { %v4283_v10 = vadd.f32 %v4917_v61, %v6678_v30  ;;  %v4920_v57 = vadd.f32 %v4919_v18, %v4918_v63  ;;  %v4983_v12 = vpop.f32.mrb[79].mxu1 }
 0x413   :  { %v4984_v14 = vadd.f32 %v4983_v12, %v4982_v35 }
 0x414   :  { %v4380_v15 = vadd.f32 %v4981_v3, %v4283_v10  ;;  %v4286_v17 = vadd.f32 %v4920_v57, %v6678_v30 }
 0x416   :  { %4424 = vst [vmem:[#allocation7 + $0x30] sm:$0xff] %v4380_v15  ;;  %v4383_v59 = vadd.f32 %v4984_v14, %v4286_v17  ;;  %v4921_v29 = vpop.f32.mrb[80].mxu0 }
 0x417   :  { %v4985_v19 = vpop.f32.mrb[80].mxu1  ;;  %v4922_v16 = vpop.f32.mrb[81].mxu0 }
 0x418   :  { %4425 = vst [vmem:[#allocation7 + $0x38] sm:$0xff] %v4383_v59  ;;  %v4923_v54 = vadd.f32 %v4922_v16, %v4921_v29  ;;  %v4986_v20 = vpop.f32.mrb[81].mxu1  ;;  %v4924_v21 = vpop.f32.mrb[82].mxu0 }
 0x419   :  { %v4987_v22 = vadd.f32 %v4986_v20, %v4985_v19  ;;  %v4988_v23 = vpop.f32.mrb[82].mxu1  ;;  %v4925_v25 = vpop.f32.mrb[83].mxu0 }
 0x41a   :  { %v4291_v27 = vadd.f32 %v4923_v54, %v6678_v30  ;;  %v4926_v55 = vadd.f32 %v4925_v25, %v4924_v21  ;;  %v4989_v41 = vpop.f32.mrb[83].mxu1 }
 0x41b   :  { %v4990_v28 = vadd.f32 %v4989_v41, %v4988_v23 }
 0x41c   :  { %v4388_v39 = vadd.f32 %v4987_v22, %v4291_v27  ;;  %v4294_v24 = vadd.f32 %v4926_v55, %v6678_v30 }
 0x41e   :  { %4426 = vst [vmem:[#allocation7 + $0x40] sm:$0xff] %v4388_v39  ;;  %v4391_v26 = vadd.f32 %v4990_v28, %v4294_v24  ;;  %v4927_v11 = vpop.f32.mrb[84].mxu0 }
 0x41f   :  { %v4991_v13 = vpop.f32.mrb[84].mxu1  ;;  %v4928_v31 = vpop.f32.mrb[85].mxu0 }
 0x420   :  { %4427 = vst [vmem:[#allocation7 + $0x48] sm:$0xff] %v4391_v26  ;;  %v4929_v32 = vadd.f32 %v4928_v31, %v4927_v11  ;;  %v4992_v33 = vpop.f32.mrb[85].mxu1  ;;  %v4930_v34 = vpop.f32.mrb[86].mxu0 }
 0x421   :  { %v4993_v1 = vadd.f32 %v4992_v33, %v4991_v13  ;;  %v4994_v36 = vpop.f32.mrb[86].mxu1  ;;  %v4931_v38 = vpop.f32.mrb[87].mxu0 }
 0x422   :  { %v4299_v2 = vadd.f32 %v4929_v32, %v6678_v30  ;;  %v4932_v40 = vadd.f32 %v4931_v38, %v4930_v34  ;;  %v4995_v4 = vpop.f32.mrb[87].mxu1 }
 0x423   :  { %v4996_v6 = vadd.f32 %v4995_v4, %v4994_v36 }
 0x424   :  { %v4396_v7 = vadd.f32 %v4993_v1, %v4299_v2  ;;  %v4302_v0 = vadd.f32 %v4932_v40, %v6678_v30 }
 0x426   :  { %4428 = vst [vmem:[#allocation7 + $0x50] sm:$0xff] %v4396_v7  ;;  %v4399_v5 = vadd.f32 %v4996_v6, %v4302_v0  ;;  %v4933_v42 = vpop.f32.mrb[88].mxu0 }
 0x427   :  { %v4997_v43 = vpop.f32.mrb[88].mxu1  ;;  %v4934_v44 = vpop.f32.mrb[89].mxu0 }
 0x428   :  { %4429 = vst [vmem:[#allocation7 + $0x58] sm:$0xff] %v4399_v5  ;;  %v4935_v45 = vadd.f32 %v4934_v44, %v4933_v42  ;;  %v4998_v8 = vpop.f32.mrb[89].mxu1  ;;  %v4936_v9 = vpop.f32.mrb[90].mxu0 }
 0x429   :  { %v4999_v46 = vadd.f32 %v4998_v8, %v4997_v43  ;;  %v5000_v47 = vpop.f32.mrb[90].mxu1  ;;  %v4937_v48 = vpop.f32.mrb[91].mxu0 }
 0x42a   :  { %v4307_v49 = vadd.f32 %v4935_v45, %v6678_v30  ;;  %v4938_v50 = vadd.f32 %v4937_v48, %v4936_v9  ;;  %v5001_v51 = vpop.f32.mrb[91].mxu1 }
 0x42b   :  { %v5002_v52 = vadd.f32 %v5001_v51, %v5000_v47 }
 0x42c   :  { %v4404_v53 = vadd.f32 %v4999_v46, %v4307_v49  ;;  %v4310_v56 = vadd.f32 %v4938_v50, %v6678_v30 }
 0x42e   :  { %4430 = vst [vmem:[#allocation7 + $0x60] sm:$0xff] %v4404_v53  ;;  %v4407_v58 = vadd.f32 %v5002_v52, %v4310_v56  ;;  %v4939_v37 = vpop.f32.mrb[92].mxu0 }
 0x42f   :  { %v5003_v60 = vpop.f32.mrb[92].mxu1  ;;  %v4940_v61 = vpop.f32.mrb[93].mxu0 }
 0x430   :  { %4431 = vst [vmem:[#allocation7 + $0x68] sm:$0xff] %v4407_v58  ;;  %v4941_v62 = vadd.f32 %v4940_v61, %v4939_v37  ;;  %v5004_v63 = vpop.f32.mrb[93].mxu1  ;;  %v4942_v3 = vpop.f32.mrb[94].mxu0 }
 0x431   :  { %v5005_v35 = vadd.f32 %v5004_v63, %v5003_v60  ;;  %v5006_v18 = vpop.f32.mrb[94].mxu1  ;;  %v4943_v10 = vpop.f32.mrb[95].mxu0 }
 0x432   :  { %v4315_v57 = vadd.f32 %v4941_v62, %v6678_v30  ;;  %v4944_v12 = vadd.f32 %v4943_v10, %v4942_v3  ;;  %v5007_v14 = vpop.f32.mrb[95].mxu1 }
 0x433   :  { %v5008_v15 = vadd.f32 %v5007_v14, %v5006_v18 }
 0x434   :  { %v4412_v17 = vadd.f32 %v5005_v35, %v4315_v57  ;;  %v4318_v59 = vadd.f32 %v4944_v12, %v6678_v30 }
 0x436   :  { %4432 = vst [vmem:[#allocation7 + $0x70] sm:$0xff] %v4412_v17  ;;  %v4415_v29 = vadd.f32 %v5008_v15, %v4318_v59 }
 0x438   :  { %4433 = vst [vmem:[#allocation7 + $0x78] sm:$0xff] %v4415_v29 }
 0x439   :  { %6054 = shalt.err (!%p6051_p6)
}
 0x43a   :  { %s6055_s28 = scalar_lea.hbm %s6715_s7, 2048 }
 0x43b   :  { %p6056_p7 = scmp.ne.s32.totalorder %s6715_s7, %s6055_s28  ;;  %p6059_p8 = scmp.lt.u32.totalorder %s6055_s28, %s6715_s7 }
 0x43d   :  { %p6061_p9 = pnand %p6059_p8, %p6056_p7 }
 0x43f   :  { %6064 = shalt.err (!%p6061_p9)
}
 0x440   :  { %s6077_s10 = smov 128   ;;  %s6078_s11 = smov 8  }
 0x441   :  { %4445 = dma.vmem_to_hbm [thread:$0]  %s4440_s25, 2048, %s6715_s7, [#allocation4], %s6077_s10, %s6077_s10, %s6078_s11  }
 0x442   :  { %6069 = dma.done.wait [#allocation4], 2048  }
 0x443   :  { %6070 = vsyncadd [#allocation4], 4294965248 }
 0x444   :  { %4449 = vsyncpa [#allocation3], 1 }
 0x445   :  { %4450 = vsyncpa [#allocation6], 1 }
 0x446   :  { %4451 = vsyncpa [#allocation4], 1 }

</bundles_post_ra>
